<compile_context>
chip_gen: v7x
topology: tpu7x:2x2x1
jax: 0.10.0
libtpu: 0.0.40
codegen_flags: <defaults>
</compile_context>

<pallas_src>
import functools

import jax
import jax.numpy as jnp
from jax.experimental import pallas as pl
from jax.experimental.pallas import tpu as pltpu


# ----------------------------------------------------------------------------
# In-kernel building blocks
# ----------------------------------------------------------------------------
def _pw(x2d, w, bias, relu):
    """1x1 conv (+ folded-BN bias, optional ReLU) as an MXU matmul.

    x2d: (M, Cin) at native dtype; w: (Cin, Cout) BN-scale-folded; bias: (1, Cout).
    """
    y = jnp.dot(x2d, w, preferred_element_type=jnp.float32)
    y = y + bias.astype(jnp.float32)
    if relu:
        y = jnp.maximum(y, 0.0)
    return y


def _dw3x3(pad_ref, x, w3, bias, stride):
    """Depthwise 3x3, padding=1, stride s (+ folded-BN bias), computed in VMEM.

    pad_ref: VMEM (H+2, W+2, C) f32 scratch; x: (H, W, C); w3: (3, 3, C) BN-folded;
    bias: (1, C).  Returns (Ho, Wo, C) f32 with Ho = (H-1)//s + 1.
    """
    h, w, c = x.shape
    ho = (h - 1) // stride + 1
    wo = (w - 1) // stride + 1
    # Zero padding happens inside VMEM -- no HBM-side jnp.pad pass.
    pad_ref[...] = jnp.zeros(pad_ref.shape, pad_ref.dtype)
    pad_ref[1:h + 1, 1:w + 1, :] = x.astype(pad_ref.dtype)
    w3 = w3.astype(jnp.float32)
    acc = None
    for ki in range(3):
        for kj in range(3):
            if stride == 1:
                tap = pad_ref[ki:ki + ho, kj:kj + wo, :]
            else:
                # Strided tap loads: the strided output is computed directly
                # (no full-resolution dw output + subsample).
                tap = pad_ref[pl.ds(ki, ho, stride=stride),
                              pl.ds(kj, wo, stride=stride), :]
            term = tap * w3[ki, kj].reshape(1, 1, c)
            acc = term if acc is None else acc + term   # init from first tap
    return acc + bias.reshape(1, 1, c).astype(jnp.float32)


def _unit_kernel(*refs, stride, has_branch1):
    """Whole InvertedResidual unit for one image; all intermediates stay in VMEM."""
    if has_branch1:
        (x_ref,
         b1_dw_w, b1_dw_b, b1_pw_w, b1_pw_b,
         pw1_w, pw1_b, dw_w, dw_b, pw2_w, pw2_b,
         o1_ref, o2_ref, pad1_ref, pad2_ref) = refs
    else:
        (x_ref,
         pw1_w, pw1_b, dw_w, dw_b, pw2_w, pw2_b,
         o2_ref, pad2_ref) = refs

    x = x_ref[0]                                         # (H, W, Cin)
    h, w, cin = x.shape
    ho, wo, bf = o2_ref.shape[1], o2_ref.shape[2], o2_ref.shape[3]

    if has_branch1:
        # branch1: dw3x3(stride) + BN -> 1x1 + BN + ReLU
        t1 = _dw3x3(pad1_ref, x, b1_dw_w[...], b1_dw_b[...], stride)
        a = _pw(t1.reshape(ho * wo, cin), b1_pw_w[...], b1_pw_b[...], relu=True)
        o1_ref[0] = a.reshape(ho, wo, bf).astype(o1_ref.dtype)

    # branch2: 1x1 + BN + ReLU -> dw3x3(stride) + BN -> 1x1 + BN + ReLU
    # (for stride == 1 the x1/x2 channel split is folded into pw1_w: the rows fed by
    #  the pass-through half are exactly zero, so no channel-slice/copy pass is needed)
    t2 = _pw(x.reshape(h * w, cin), pw1_w[...], pw1_b[...], relu=True)
    t2 = _dw3x3(pad2_ref, t2.reshape(h, w, bf), dw_w[...], dw_b[...], stride)
    y = _pw(t2.reshape(ho * wo, bf), pw2_w[...], pw2_b[...], relu=True)
    o2_ref[0] = y.reshape(ho, wo, bf).astype(o2_ref.dtype)


# ----------------------------------------------------------------------------
# pallas_call wrapper (grid over batch, weights resident)
# ----------------------------------------------------------------------------
def _resident_spec(arr):
    nd = arr.ndim
    return pl.BlockSpec(arr.shape, lambda i: (0,) * nd)


def _unit_pallas_call(x_nhwc, params, stride):
    """Runs the fused unit kernel.  Returns (a, branch2), each (N, Ho, Wo, BF) NHWC."""
    n, h, w, cin = x_nhwc.shape
    ho = (h - 1) // stride + 1
    wo = (w - 1) // stride + 1
    cparams = pltpu.CompilerParams(dimension_semantics=("parallel",))
    x_spec = pl.BlockSpec((1, h, w, cin), lambda i: (i, 0, 0, 0))

    if stride == 1:
        bf = cin // 2
        weights = (params["b2_pw1_w"], params["b2_pw1_b"],
                   params["b2_dw_w"], params["b2_dw_b"],
                   params["b2_pw2_w"], params["b2_pw2_b"])
        b2 = pl.pallas_call(
            functools.partial(_unit_kernel, stride=1, has_branch1=False),
            grid=(n,),
            in_specs=[x_spec] + [_resident_spec(p) for p in weights],
            out_specs=pl.BlockSpec((1, h, w, bf), lambda i: (i, 0, 0, 0)),
            out_shape=jax.ShapeDtypeStruct((n, h, w, bf), x_nhwc.dtype),
            scratch_shapes=[pltpu.VMEM((h + 2, w + 2, bf), jnp.float32)],
            compiler_params=cparams,
        )(x_nhwc, *weights)
        a = x_nhwc[..., :bf]   # pass-through half; fused by XLA into the epilogue
        return a, b2

    bf = params["b2_pw2_w"].shape[1]
    weights = (params["b1_dw_w"], params["b1_dw_b"],
               params["b1_pw_w"], params["b1_pw_b"],
               params["b2_pw1_w"], params["b2_pw1_b"],
               params["b2_dw_w"], params["b2_dw_b"],
               params["b2_pw2_w"], params["b2_pw2_b"])
    out_spec = pl.BlockSpec((1, ho, wo, bf), lambda i: (i, 0, 0, 0))
    a, b2 = pl.pallas_call(
        functools.partial(_unit_kernel, stride=stride, has_branch1=True),
        grid=(n,),
        in_specs=[x_spec] + [_resident_spec(p) for p in weights],
        out_specs=(out_spec, out_spec),
        out_shape=(jax.ShapeDtypeStruct((n, ho, wo, bf), x_nhwc.dtype),
                   jax.ShapeDtypeStruct((n, ho, wo, bf), x_nhwc.dtype)),
        scratch_shapes=[pltpu.VMEM((h + 2, w + 2, cin), jnp.float32),
                        pltpu.VMEM((h + 2, w + 2, bf), jnp.float32)],
        compiler_params=cparams,
    )(x_nhwc, *weights)
    return a, b2


# ----------------------------------------------------------------------------
# Parameter construction (deterministic; BN folded into weights, inference mode)
# ----------------------------------------------------------------------------
def _bn_fold(gamma, beta, running_mean, running_var, eps=1e-5):
    scale = gamma / jnp.sqrt(running_var + eps)
    return scale, beta - running_mean * scale


def init_inverted_residual_params(key, in_channels, out_channels, stride):
    if not 1 <= stride <= 3:
        raise ValueError("illegal stride value")
    bf = out_channels // 2
    assert stride != 1 or in_channels == bf << 1
    keys = iter(jax.random.split(key, 32))

    def conv1x1(cin, cout):                 # stored (Cin, Cout) for x @ W
        return 0.1 * jax.random.normal(next(keys), (cin, cout), jnp.float32)

    def dw3x3(c):                           # stored (kh, kw, C)
        return 0.1 * jax.random.normal(next(keys), (3, 3, c), jnp.float32)

    def bn(c):                              # inference BN -> (scale, bias)
        gamma = 1.0 + 0.1 * jax.random.normal(next(keys), (c,), jnp.float32)
        beta = 0.1 * jax.random.normal(next(keys), (c,), jnp.float32)
        return _bn_fold(gamma, beta, jnp.zeros((c,), jnp.float32),
                        jnp.ones((c,), jnp.float32))

    p = {}
    if stride > 1:
        w = dw3x3(in_channels); s, b = bn(in_channels)
        p["b1_dw_w"], p["b1_dw_b"] = w * s.reshape(1, 1, -1), b.reshape(1, -1)
        w = conv1x1(in_channels, bf); s, b = bn(bf)
        p["b1_pw_w"], p["b1_pw_b"] = w * s.reshape(1, -1), b.reshape(1, -1)

    cin2 = in_channels if stride > 1 else bf
    w = conv1x1(cin2, bf); s, b = bn(bf)
    w = w * s.reshape(1, -1)
    if stride == 1:
        # Fold the chunk(2)-split into the weight: the rows fed by the pass-through
        # half are exactly zero, so the kernel can consume the full-channel input
        # block without an extra slice/copy HBM pass (exact for finite inputs).
        w = jnp.concatenate([jnp.zeros_like(w), w], axis=0)     # (2*bf, bf)
    p["b2_pw1_w"], p["b2_pw1_b"] = w, b.reshape(1, -1)
    w = dw3x3(bf); s, b = bn(bf)
    p["b2_dw_w"], p["b2_dw_b"] = w * s.reshape(1, 1, -1), b.reshape(1, -1)
    w = conv1x1(bf, bf); s, b = bn(bf)
    p["b2_pw2_w"], p["b2_pw2_b"] = w * s.reshape(1, -1), b.reshape(1, -1)
    return p


# ----------------------------------------------------------------------------
# Forward pass (mirrors InvertedResidual.forward, incl. channel_shuffle(groups=2))
# ----------------------------------------------------------------------------
@functools.partial(jax.jit, static_argnames=("stride",))
def inverted_residual_forward(x_nchw, params, *, stride):
    x = jnp.transpose(x_nchw, (0, 2, 3, 1))               # NCHW -> NHWC
    a, b2 = _unit_pallas_call(x, params, stride)           # each (N, Ho, Wo, BF)
    n, ho, wo, bf = b2.shape
    # cat((a, b2), C) + channel_shuffle(groups=2) == channel interleave; folded into
    # the single required NHWC->NCHW output transpose (no extra HBM pass).
    out = jnp.stack([a, b2], axis=-1)                      # (N, Ho, Wo, BF, 2)
    return jnp.transpose(out, (0, 3, 4, 1, 2)).reshape(n, 2 * bf, ho, wo)


# ----------------------------------------------------------------------------
# Pure-JAX reference (same folded params / same math, used for a numeric check)
# ----------------------------------------------------------------------------
def _ref_forward(x_nchw, params, stride):
    x = jnp.transpose(x_nchw, (0, 2, 3, 1))

    def pw(t, w, b, relu):
        y = jnp.einsum("nhwc,cd->nhwd", t, w) + b.reshape(1, 1, 1, -1)
        return jnp.maximum(y, 0.0) if relu else y

    def dw(t, w, b, s):
        n, h, wd, c = t.shape
        tp = jnp.pad(t, ((0, 0), (1, 1), (1, 1), (0, 0)))
        ho, wo = (h - 1) // s + 1, (wd - 1) // s + 1
        acc = jnp.zeros((n, ho, wo, c), jnp.float32)
        for ki in range(3):
            for kj in range(3):
                acc = acc + tp[:, ki:ki + s * (ho - 1) + 1:s,
                               kj:kj + s * (wo - 1) + 1:s, :] * w[ki, kj]
        return acc + b.reshape(1, 1, 1, -1)

    cin = x.shape[-1]
    if stride == 1:
        bf = cin // 2
        a = x[..., :bf]
    else:
        a = pw(dw(x, params["b1_dw_w"], params["b1_dw_b"], stride),
               params["b1_pw_w"], params["b1_pw_b"], True)
    t = pw(x, params["b2_pw1_w"], params["b2_pw1_b"], True)
    t = dw(t, params["b2_dw_w"], params["b2_dw_b"], stride)
    b2 = pw(t, params["b2_pw2_w"], params["b2_pw2_b"], True)
    n, ho, wo, bf = b2.shape
    out = jnp.stack([a, b2], axis=-1)
    return jnp.transpose(out, (0, 3, 4, 1, 2)).reshape(n, 2 * bf, ho, wo)


# ----------------------------------------------------------------------------
if __name__ == "__main__":
    key = jax.random.PRNGKey(0)
    k_p1, k_p2, k_x1, k_x2 = jax.random.split(key, 4)

    # stride = 1 (branch1 is the identity pass-through on the first channel half)
    in_c, out_c = 8, 8
    params1 = init_inverted_residual_params(k_p1, in_c, out_c, stride=1)
    x1 = jax.random.normal(k_x1, (2, in_c, 16, 16), jnp.float32)
    y1 = inverted_residual_forward(x1, params1, stride=1)
    jax.block_until_ready(y1)
    assert y1.shape == (2, out_c, 16, 16), y1.shape
    r1 = _ref_forward(x1, params1, 1)
    assert float(jnp.max(jnp.abs(y1 - r1))) < 1e-3

    # stride = 2 (both branches active, spatial downsampling done inside the kernel)
    in_c2, out_c2 = 4, 8
    params2 = init_inverted_residual_params(k_p2, in_c2, out_c2, stride=2)
    x2 = jax.random.normal(k_x2, (2, in_c2, 16, 16), jnp.float32)
    y2 = inverted_residual_forward(x2, params2, stride=2)
    jax.block_until_ready(y2)
    assert y2.shape == (2, out_c2, 8, 8), y2.shape
    r2 = _ref_forward(x2, params2, 2)
    assert float(jnp.max(jnp.abs(y2 - r2))) < 1e-3

    print("KERNEL_OK")
</pallas_src>

<mosaic_0001>
module attributes {stable_mosaic.version = 11 : i64} {
  func.func @_unit_kernel(%arg0: i32, %arg1: memref<1x16x16x8xf32, #tpu.memory_space<vmem>>, %arg2: memref<8x4xf32, #tpu.memory_space<vmem>>, %arg3: memref<1x4xf32, #tpu.memory_space<vmem>>, %arg4: memref<3x3x4xf32, #tpu.memory_space<vmem>>, %arg5: memref<1x4xf32, #tpu.memory_space<vmem>>, %arg6: memref<4x4xf32, #tpu.memory_space<vmem>>, %arg7: memref<1x4xf32, #tpu.memory_space<vmem>>, %arg8: memref<1x16x16x4xf32, #tpu.memory_space<vmem>>, %arg9: memref<18x18x4xf32, #tpu.memory_space<vmem>>) attributes {dimension_semantics = [#tpu.dimension_semantics<parallel>], iteration_bounds = array<i64: 2>, scalar_prefetch = 0 : i64, scratch_operands = 1 : i64, tpu.core_type = #tpu.core_type<tc>, window_params = [{transform_indices = @transform_0, window_bounds = array<i64: 1, 16, 16, 8>}, {pipeline_mode = #tpu.pipeline_mode<synchronous>, transform_indices = @transform_1, window_bounds = array<i64: 8, 4>}, {pipeline_mode = #tpu.pipeline_mode<synchronous>, transform_indices = @transform_2, window_bounds = array<i64: 1, 4>}, {pipeline_mode = #tpu.pipeline_mode<synchronous>, transform_indices = @transform_3, window_bounds = array<i64: 3, 3, 4>}, {pipeline_mode = #tpu.pipeline_mode<synchronous>, transform_indices = @transform_4, window_bounds = array<i64: 1, 4>}, {pipeline_mode = #tpu.pipeline_mode<synchronous>, transform_indices = @transform_5, window_bounds = array<i64: 4, 4>}, {pipeline_mode = #tpu.pipeline_mode<synchronous>, transform_indices = @transform_6, window_bounds = array<i64: 1, 4>}, {transform_indices = @transform_7, window_bounds = array<i64: 1, 16, 16, 4>}]} {
    %c0 = arith.constant 0 : index
    %c0_0 = arith.constant 0 : index
    %c0_1 = arith.constant 0 : index
    %c0_2 = arith.constant 0 : index
    %0 = vector.load %arg1[%c0, %c0_0, %c0_1, %c0_2] : memref<1x16x16x8xf32, #tpu.memory_space<vmem>>, vector<1x16x16x8xf32>
    %1 = vector.shape_cast %0 : vector<1x16x16x8xf32> to vector<16x16x8xf32>
    %2 = vector.shape_cast %1 : vector<16x16x8xf32> to vector<256x8xf32>
    %c0_3 = arith.constant 0 : index
    %c0_4 = arith.constant 0 : index
    %3 = vector.load %arg2[%c0_3, %c0_4] : memref<8x4xf32, #tpu.memory_space<vmem>>, vector<8x4xf32>
    %c0_5 = arith.constant 0 : index
    %c0_6 = arith.constant 0 : index
    %4 = vector.load %arg3[%c0_5, %c0_6] : memref<1x4xf32, #tpu.memory_space<vmem>>, vector<1x4xf32>
    %cst = arith.constant dense<0.000000e+00> : vector<256x4xf32>
    %5 = tpu.matmul %2, %3, %cst {dimension_numbers = #tpu.dot_dimension_numbers<[1], [0], [0], [1], [0, 0, 1, 1], [], []>} : vector<256x8xf32>, vector<8x4xf32>, vector<256x4xf32> -> vector<256x4xf32>
    %6 = vector.broadcast %4 : vector<1x4xf32> to vector<256x4xf32>
    %7 = arith.addf %5, %6 : vector<256x4xf32>
    %cst_7 = arith.constant 0.000000e+00 : f32
    %8 = vector.broadcast %cst_7 : f32 to vector<256x4xf32>
    %9 = arith.maximumf %7, %8 : vector<256x4xf32>
    %10 = vector.shape_cast %9 : vector<256x4xf32> to vector<16x16x4xf32>
    %c0_8 = arith.constant 0 : index
    %c0_9 = arith.constant 0 : index
    %c0_10 = arith.constant 0 : index
    %11 = vector.load %arg4[%c0_8, %c0_9, %c0_10] : memref<3x3x4xf32, #tpu.memory_space<vmem>>, vector<3x3x4xf32>
    %c0_11 = arith.constant 0 : index
    %c0_12 = arith.constant 0 : index
    %12 = vector.load %arg5[%c0_11, %c0_12] : memref<1x4xf32, #tpu.memory_space<vmem>>, vector<1x4xf32>
    %cst_13 = arith.constant 0.000000e+00 : f32
    %13 = vector.broadcast %cst_13 : f32 to vector<18x18x4xf32>
    %c0_14 = arith.constant 0 : index
    %c0_15 = arith.constant 0 : index
    %c0_16 = arith.constant 0 : index
    %14 = vector.load %arg9[%c0_14, %c0_15, %c0_16] : memref<18x18x4xf32, #tpu.memory_space<vmem>>, vector<18x18x4xf32>
    tpu.vector_store %arg9[%c0_14, %c0_15, %c0_16], %13 {strides = array<i32>} : memref<18x18x4xf32, #tpu.memory_space<vmem>>, vector<18x18x4xf32>,
    %c1 = arith.constant 1 : index
    %c1_17 = arith.constant 1 : index
    %c0_18 = arith.constant 0 : index
    %15 = vector.load %arg9[%c1, %c1_17, %c0_18] : memref<18x18x4xf32, #tpu.memory_space<vmem>>, vector<16x16x4xf32>
    tpu.vector_store %arg9[%c1, %c1_17, %c0_18], %10 {strides = array<i32>} : memref<18x18x4xf32, #tpu.memory_space<vmem>>, vector<16x16x4xf32>,
    %c0_19 = arith.constant 0 : index
    %c0_20 = arith.constant 0 : index
    %c0_21 = arith.constant 0 : index
    %16 = vector.load %arg9[%c0_19, %c0_20, %c0_21] : memref<18x18x4xf32, #tpu.memory_space<vmem>>, vector<16x16x4xf32>
    %17 = vector.extract_strided_slice %11 {offsets = [0, 0, 0], sizes = [1, 1, 4], strides = [1, 1, 1]} : vector<3x3x4xf32> to vector<1x1x4xf32>
    %18 = vector.shape_cast %17 : vector<1x1x4xf32> to vector<4xf32>
    %19 = vector.shape_cast %18 : vector<4xf32> to vector<1x1x4xf32>
    %20 = vector.broadcast %19 : vector<1x1x4xf32> to vector<16x16x4xf32>
    %21 = arith.mulf %16, %20 : vector<16x16x4xf32>
    %c0_22 = arith.constant 0 : index
    %c1_23 = arith.constant 1 : index
    %c0_24 = arith.constant 0 : index
    %22 = vector.load %arg9[%c0_22, %c1_23, %c0_24] : memref<18x18x4xf32, #tpu.memory_space<vmem>>, vector<16x16x4xf32>
    %23 = vector.extract_strided_slice %11 {offsets = [0, 1, 0], sizes = [1, 1, 4], strides = [1, 1, 1]} : vector<3x3x4xf32> to vector<1x1x4xf32>
    %24 = vector.shape_cast %23 : vector<1x1x4xf32> to vector<4xf32>
    %25 = vector.shape_cast %24 : vector<4xf32> to vector<1x1x4xf32>
    %26 = vector.broadcast %25 : vector<1x1x4xf32> to vector<16x16x4xf32>
    %27 = arith.mulf %22, %26 : vector<16x16x4xf32>
    %28 = arith.addf %21, %27 : vector<16x16x4xf32>
    %c0_25 = arith.constant 0 : index
    %c2 = arith.constant 2 : index
    %c0_26 = arith.constant 0 : index
    %29 = vector.load %arg9[%c0_25, %c2, %c0_26] : memref<18x18x4xf32, #tpu.memory_space<vmem>>, vector<16x16x4xf32>
    %30 = vector.extract_strided_slice %11 {offsets = [0, 2, 0], sizes = [1, 1, 4], strides = [1, 1, 1]} : vector<3x3x4xf32> to vector<1x1x4xf32>
    %31 = vector.shape_cast %30 : vector<1x1x4xf32> to vector<4xf32>
    %32 = vector.shape_cast %31 : vector<4xf32> to vector<1x1x4xf32>
    %33 = vector.broadcast %32 : vector<1x1x4xf32> to vector<16x16x4xf32>
    %34 = arith.mulf %29, %33 : vector<16x16x4xf32>
    %35 = arith.addf %28, %34 : vector<16x16x4xf32>
    %c1_27 = arith.constant 1 : index
    %c0_28 = arith.constant 0 : index
    %c0_29 = arith.constant 0 : index
    %36 = vector.load %arg9[%c1_27, %c0_28, %c0_29] : memref<18x18x4xf32, #tpu.memory_space<vmem>>, vector<16x16x4xf32>
    %37 = vector.extract_strided_slice %11 {offsets = [1, 0, 0], sizes = [1, 1, 4], strides = [1, 1, 1]} : vector<3x3x4xf32> to vector<1x1x4xf32>
    %38 = vector.shape_cast %37 : vector<1x1x4xf32> to vector<4xf32>
    %39 = vector.shape_cast %38 : vector<4xf32> to vector<1x1x4xf32>
    %40 = vector.broadcast %39 : vector<1x1x4xf32> to vector<16x16x4xf32>
    %41 = arith.mulf %36, %40 : vector<16x16x4xf32>
    %42 = arith.addf %35, %41 : vector<16x16x4xf32>
    %c1_30 = arith.constant 1 : index
    %c1_31 = arith.constant 1 : index
    %c0_32 = arith.constant 0 : index
    %43 = vector.load %arg9[%c1_30, %c1_31, %c0_32] : memref<18x18x4xf32, #tpu.memory_space<vmem>>, vector<16x16x4xf32>
    %44 = vector.extract_strided_slice %11 {offsets = [1, 1, 0], sizes = [1, 1, 4], strides = [1, 1, 1]} : vector<3x3x4xf32> to vector<1x1x4xf32>
    %45 = vector.shape_cast %44 : vector<1x1x4xf32> to vector<4xf32>
    %46 = vector.shape_cast %45 : vector<4xf32> to vector<1x1x4xf32>
    %47 = vector.broadcast %46 : vector<1x1x4xf32> to vector<16x16x4xf32>
    %48 = arith.mulf %43, %47 : vector<16x16x4xf32>
    %49 = arith.addf %42, %48 : vector<16x16x4xf32>
    %c1_33 = arith.constant 1 : index
    %c2_34 = arith.constant 2 : index
    %c0_35 = arith.constant 0 : index
    %50 = vector.load %arg9[%c1_33, %c2_34, %c0_35] : memref<18x18x4xf32, #tpu.memory_space<vmem>>, vector<16x16x4xf32>
    %51 = vector.extract_strided_slice %11 {offsets = [1, 2, 0], sizes = [1, 1, 4], strides = [1, 1, 1]} : vector<3x3x4xf32> to vector<1x1x4xf32>
    %52 = vector.shape_cast %51 : vector<1x1x4xf32> to vector<4xf32>
    %53 = vector.shape_cast %52 : vector<4xf32> to vector<1x1x4xf32>
    %54 = vector.broadcast %53 : vector<1x1x4xf32> to vector<16x16x4xf32>
    %55 = arith.mulf %50, %54 : vector<16x16x4xf32>
    %56 = arith.addf %49, %55 : vector<16x16x4xf32>
    %c2_36 = arith.constant 2 : index
    %c0_37 = arith.constant 0 : index
    %c0_38 = arith.constant 0 : index
    %57 = vector.load %arg9[%c2_36, %c0_37, %c0_38] : memref<18x18x4xf32, #tpu.memory_space<vmem>>, vector<16x16x4xf32>
    %58 = vector.extract_strided_slice %11 {offsets = [2, 0, 0], sizes = [1, 1, 4], strides = [1, 1, 1]} : vector<3x3x4xf32> to vector<1x1x4xf32>
    %59 = vector.shape_cast %58 : vector<1x1x4xf32> to vector<4xf32>
    %60 = vector.shape_cast %59 : vector<4xf32> to vector<1x1x4xf32>
    %61 = vector.broadcast %60 : vector<1x1x4xf32> to vector<16x16x4xf32>
    %62 = arith.mulf %57, %61 : vector<16x16x4xf32>
    %63 = arith.addf %56, %62 : vector<16x16x4xf32>
    %c2_39 = arith.constant 2 : index
    %c1_40 = arith.constant 1 : index
    %c0_41 = arith.constant 0 : index
    %64 = vector.load %arg9[%c2_39, %c1_40, %c0_41] : memref<18x18x4xf32, #tpu.memory_space<vmem>>, vector<16x16x4xf32>
    %65 = vector.extract_strided_slice %11 {offsets = [2, 1, 0], sizes = [1, 1, 4], strides = [1, 1, 1]} : vector<3x3x4xf32> to vector<1x1x4xf32>
    %66 = vector.shape_cast %65 : vector<1x1x4xf32> to vector<4xf32>
    %67 = vector.shape_cast %66 : vector<4xf32> to vector<1x1x4xf32>
    %68 = vector.broadcast %67 : vector<1x1x4xf32> to vector<16x16x4xf32>
    %69 = arith.mulf %64, %68 : vector<16x16x4xf32>
    %70 = arith.addf %63, %69 : vector<16x16x4xf32>
    %c2_42 = arith.constant 2 : index
    %c2_43 = arith.constant 2 : index
    %c0_44 = arith.constant 0 : index
    %71 = vector.load %arg9[%c2_42, %c2_43, %c0_44] : memref<18x18x4xf32, #tpu.memory_space<vmem>>, vector<16x16x4xf32>
    %72 = vector.extract_strided_slice %11 {offsets = [2, 2, 0], sizes = [1, 1, 4], strides = [1, 1, 1]} : vector<3x3x4xf32> to vector<1x1x4xf32>
    %73 = vector.shape_cast %72 : vector<1x1x4xf32> to vector<4xf32>
    %74 = vector.shape_cast %73 : vector<4xf32> to vector<1x1x4xf32>
    %75 = vector.broadcast %74 : vector<1x1x4xf32> to vector<16x16x4xf32>
    %76 = arith.mulf %71, %75 : vector<16x16x4xf32>
    %77 = arith.addf %70, %76 : vector<16x16x4xf32>
    %78 = vector.shape_cast %12 : vector<1x4xf32> to vector<1x1x4xf32>
    %79 = vector.broadcast %78 : vector<1x1x4xf32> to vector<16x16x4xf32>
    %80 = arith.addf %77, %79 : vector<16x16x4xf32>
    %81 = vector.shape_cast %80 : vector<16x16x4xf32> to vector<256x4xf32>
    %c0_45 = arith.constant 0 : index
    %c0_46 = arith.constant 0 : index
    %82 = vector.load %arg6[%c0_45, %c0_46] : memref<4x4xf32, #tpu.memory_space<vmem>>, vector<4x4xf32>
    %c0_47 = arith.constant 0 : index
    %c0_48 = arith.constant 0 : index
    %83 = vector.load %arg7[%c0_47, %c0_48] : memref<1x4xf32, #tpu.memory_space<vmem>>, vector<1x4xf32>
    %cst_49 = arith.constant dense<0.000000e+00> : vector<256x4xf32>
    %84 = tpu.matmul %81, %82, %cst_49 {dimension_numbers = #tpu.dot_dimension_numbers<[1], [0], [0], [1], [0, 0, 1, 1], [], []>} : vector<256x4xf32>, vector<4x4xf32>, vector<256x4xf32> -> vector<256x4xf32>
    %85 = vector.broadcast %83 : vector<1x4xf32> to vector<256x4xf32>
    %86 = arith.addf %84, %85 : vector<256x4xf32>
    %cst_50 = arith.constant 0.000000e+00 : f32
    %87 = vector.broadcast %cst_50 : f32 to vector<256x4xf32>
    %88 = arith.maximumf %86, %87 : vector<256x4xf32>
    %89 = vector.shape_cast %88 : vector<256x4xf32> to vector<16x16x4xf32>
    %c0_51 = arith.constant 0 : index
    %c0_52 = arith.constant 0 : index
    %c0_53 = arith.constant 0 : index
    %c0_54 = arith.constant 0 : index
    %90 = vector.load %arg8[%c0_51, %c0_52, %c0_53, %c0_54] : memref<1x16x16x4xf32, #tpu.memory_space<vmem>>, vector<1x16x16x4xf32>
    %91 = vector.shape_cast %90 : vector<1x16x16x4xf32> to vector<16x16x4xf32>
    %92 = vector.shape_cast %89 : vector<16x16x4xf32> to vector<1x16x16x4xf32>
    tpu.vector_store %arg8[%c0_51, %c0_52, %c0_53, %c0_54], %92 {strides = array<i32>} : memref<1x16x16x4xf32, #tpu.memory_space<vmem>>, vector<1x16x16x4xf32>,
    return
  }
  func.func @transform_0(%arg0: i32) -> (i32, i32, i32, i32) {
    %c0_i32 = arith.constant 0 : i32
    %c0_i32_0 = arith.constant 0 : i32
    %c0_i32_1 = arith.constant 0 : i32
    %c0_i32_2 = arith.constant 0 : i32
    return %arg0, %c0_i32, %c0_i32_0, %c0_i32_1 : i32, i32, i32, i32
  }
  func.func @transform_1(%arg0: i32) -> (i32, i32) {
    %c0_i32 = arith.constant 0 : i32
    %c0_i32_0 = arith.constant 0 : i32
    %c0_i32_1 = arith.constant 0 : i32
    return %c0_i32, %c0_i32_0 : i32, i32
  }
  func.func @transform_2(%arg0: i32) -> (i32, i32) {
    %c0_i32 = arith.constant 0 : i32
    %c0_i32_0 = arith.constant 0 : i32
    %c0_i32_1 = arith.constant 0 : i32
    return %c0_i32, %c0_i32_0 : i32, i32
  }
  func.func @transform_3(%arg0: i32) -> (i32, i32, i32) {
    %c0_i32 = arith.constant 0 : i32
    %c0_i32_0 = arith.constant 0 : i32
    %c0_i32_1 = arith.constant 0 : i32
    %c0_i32_2 = arith.constant 0 : i32
    return %c0_i32, %c0_i32_0, %c0_i32_1 : i32, i32, i32
  }
  func.func @transform_4(%arg0: i32) -> (i32, i32) {
    %c0_i32 = arith.constant 0 : i32
    %c0_i32_0 = arith.constant 0 : i32
    %c0_i32_1 = arith.constant 0 : i32
    return %c0_i32, %c0_i32_0 : i32, i32
  }
  func.func @transform_5(%arg0: i32) -> (i32, i32) {
    %c0_i32 = arith.constant 0 : i32
    %c0_i32_0 = arith.constant 0 : i32
    %c0_i32_1 = arith.constant 0 : i32
    return %c0_i32, %c0_i32_0 : i32, i32
  }
  func.func @transform_6(%arg0: i32) -> (i32, i32) {
    %c0_i32 = arith.constant 0 : i32
    %c0_i32_0 = arith.constant 0 : i32
    %c0_i32_1 = arith.constant 0 : i32
    return %c0_i32, %c0_i32_0 : i32, i32
  }
  func.func @transform_7(%arg0: i32) -> (i32, i32, i32, i32) {
    %c0_i32 = arith.constant 0 : i32
    %c0_i32_0 = arith.constant 0 : i32
    %c0_i32_1 = arith.constant 0 : i32
    %c0_i32_2 = arith.constant 0 : i32
    return %arg0, %c0_i32, %c0_i32_0, %c0_i32_1 : i32, i32, i32, i32
  }
}

</mosaic_0001>

<bundles_post_ra>
// kernel: inverted_residual_forward.1
= control target key start
LH: loop header
LB: loop body
LE: loop exit
PB: predicated region body
PF: predicated region fallthrough
CT: control target
= control target key end

     0   :  { %s2431_s24 = smov 0   ;;  %s3420_s0 = inlined_call_operand.vmem [shape: f32[2,16,16,8], index: 0, kind: input, shape index: {}]   ;;  %s3421_s1 = inlined_call_operand.vmem [shape: f32[8,4], index: 1, kind: input, shape index: {}]   ;;  %s3422_s2 = inlined_call_operand.vmem [shape: f32[1,4], index: 2, kind: input, shape index: {}]   ;;  %s3423_s3 = inlined_call_operand.vmem [shape: f32[3,3,4], index: 3, kind: input, shape index: {}]   ;;  %s3424_s4 = inlined_call_operand.vmem [shape: f32[1,4], index: 4, kind: input, shape index: {}]   ;;  %s3425_s5 = inlined_call_operand.vmem [shape: f32[4,4], index: 5, kind: input, shape index: {}]   ;;  %s3426_s6 = inlined_call_operand.vmem [shape: f32[1,4], index: 6, kind: input, shape index: {}]   ;;  %s3427_s7 = inlined_call_operand.vmem [shape: f32[2,16,16,4], index: 7, kind: output, shape index: {}]  }
   0x1 LB: > { %s2125_s25 = sadd.s32 4294967295, %s2388_s24   ;;  %p2129_p0 = scmp.ge.s32.totalorder %s2388_s24, 1  ;;  %s2388_s24 = sphi %s2431_s24, %s17_s24  }
   0x2   : > { %p237_p1 = scmp.lt.s32.totalorder %s2388_s24, 3 }
   0x4   : > { %p238_p2 = pnand %p2129_p0, %p237_p1 }
   0x5   : > { %v311_v0 = vld [vmem:[%s3421_s1] sm:$0xff] (!%p238_p2)  ;;  %p269_p3 = scmp.lt.s32.totalorder (!%p238_p2), %s2125_s25, 1  ;;  %vm319_vm0 = vcmask (!%p238_p2), 64512   ;;  %vm677_vm1 = vcmask (!%p238_p2), 31744   ;;  %vm680_vm2 = vcmask (!%p238_p2), 25600   ;;  %v2390_v33 = vmov (!%p238_p2), 0.0  }
   0x6   : > { %241 = sbr.rel (%p238_p2) target bundleno = 626 (0x272), region = 48  ;;  %2272 = vmatprep.subr.mxu0 (!%p238_p2), %v311_v0  ;;  %683 = vst.msk [vmem:[#allocation2 + $0x20] sm:$0xff] (!%p238_p2), %vm677_vm1, %v2390_v33  ;;  %678 = vst.msk [vmem:[#allocation2] sm:$0xff] (!%p238_p2), %vm677_vm1, %v2390_v33  ;;  %v1673_v34 = vld [vmem:[%s3425_s5] sm:$0xf] (!%p238_p2)  ;;  %vm1777_vm3 = vcmask (!%p238_p2), 1043456   ;;  %v798_v35 = vlaneseq (!%p238_p2) }
   0x7   : > { %2273 = vmatpush3.msra.mxu0 (!%p238_p2), %v311_v0  ;;  %684 = vst.msk [vmem:[#allocation2 + $0x28] sm:$0x3] (!%p238_p2), %vm680_vm2, %v2390_v33  ;;  %681 = vst.msk [vmem:[#allocation2 + $0x10] sm:$0x3] (!%p238_p2), %vm680_vm2, %v2390_v33  ;;  %2322 = vmatprep.subr.msk.mxu1 (!%p238_p2), %vm1777_vm3, %v1673_v34  ;;  %v673_v39 = vld [vmem:[%s3423_s3] sm:$0x7] (!%p238_p2) }
   0x8   : > { %679 = vst.msk [vmem:[#allocation2 + $0x8] sm:$0xff] (!%p238_p2), %vm677_vm1, %v2390_v33  ;;  %682 = vst.msk [vmem:[#allocation2 + $0x18] sm:$0xff] (!%p238_p2), %vm677_vm1, %v2390_v33  ;;  %2323 = vmatpush3.msk.msra.mxu1 (!%p238_p2), %vm1777_vm3, %v1673_v34  ;;  %v799_v36 = vshrl.u32 (!%p238_p2), %v798_v35, 7  ;;  %v2581_v40 = vld [vmem:[%s3422_s2] ss:$0 sm:$0xff] (!%p238_p2) }
   0x9   : > { %685 = vst.msk [vmem:[#allocation2 + $0x30] sm:$0xff] (!%p238_p2), %vm677_vm1, %v2390_v33  ;;  %686 = vst.msk [vmem:[#allocation2 + $0x38] sm:$0xff] (!%p238_p2), %vm677_vm1, %v2390_v33 }
   0xa   : > { %687 = vst.msk [vmem:[#allocation2 + $0x40] sm:$0x3] (!%p238_p2), %vm680_vm2, %v2390_v33  ;;  %690 = vst.msk [vmem:[#allocation2 + $0x58] sm:$0x3] (!%p238_p2), %vm680_vm2, %v2390_v33  ;;  %v2573_v37 = vsub.s32 (!%p238_p2), 0, %v799_v36  ;;  %v868_v38 = vsub.s32 (!%p238_p2), 1, %v799_v36 }
   0xb   : > { %688 = vst.msk [vmem:[#allocation2 + $0x48] sm:$0xff] (!%p238_p2), %vm677_vm1, %v2390_v33  ;;  %689 = vst.msk [vmem:[#allocation2 + $0x50] sm:$0xff] (!%p238_p2), %vm677_vm1, %v2390_v33  ;;  %v968_v44 = vsub.s32 (!%p238_p2), 2, %v799_v36 }
   0xc   : > { %691 = vst.msk [vmem:[#allocation2 + $0x60] sm:$0xff] (!%p238_p2), %vm677_vm1, %v2390_v33  ;;  %692 = vst.msk [vmem:[#allocation2 + $0x68] sm:$0xff] (!%p238_p2), %vm677_vm1, %v2390_v33  ;;  %v2584_v42 = vrot.slane (!%p238_p2), %v673_v39, %v2573_v37  ;;  %v2586_v43 = vrot.slane (!%p238_p2), %v673_v39, %v868_v38 }
   0xd   : > { %s3429_s25 = smov (!%p269_p3, %s2125_s25), 1  ;;  %693 = vst.msk [vmem:[#allocation2 + $0x70] sm:$0x3] %vm680_vm2, %v2390_v33  ;;  %696 = vst.msk [vmem:[#allocation2 + $0x88] sm:$0x3] %vm680_vm2, %v2390_v33  ;;  %v766_v47 = vld [vmem:[#allocation2] sm:$0xff]  ;;  %v2592_v57 = vrot.slane %v673_v39, %v968_v44 }
   0xe   : > { %s2204_s28 = sshll.u32 %s3429_s25, 8  ;;  %694 = vst.msk [vmem:[#allocation2 + $0x78] sm:$0xff] %vm677_vm1, %v2390_v33  ;;  %695 = vst.msk [vmem:[#allocation2 + $0x80] sm:$0xff] %vm677_vm1, %v2390_v33  ;;  %v802_v55 = vmul.f32 %v2584_v42, %v766_v47 }
   0xf   : > { %s2450_s8 = scalar_lea.vmem %s3420_s0, %s2204_s28  ;;  %697 = vst.msk [vmem:[#allocation2 + $0x90] sm:$0xff] %vm677_vm1, %v2390_v33  ;;  %698 = vst.msk [vmem:[#allocation2 + $0x98] sm:$0xff] %vm677_vm1, %v2390_v33  ;;  %v834_v48 = vld [vmem:[#allocation2 + $0x1] sm:$0xff]  ;;  %v835_v51 = vld [vmem:[#allocation2 + $0x9] sm:$0xff]  ;;  %s3320_s30 = scalar_lea.vmem %s3427_s7, %s2204_s28 }
  0x10   : > { %v279_v1 = vld [vmem:[%s2450_s8] sm:$0xff]  ;;  %v280_v2 = vld [vmem:[%s2450_s8 + $0x8] sm:$0xff]  ;;  %v281_v3 = vld [vmem:[%s2450_s8 + $0x10] sm:$0xff]  ;;  %699 = vst.msk [vmem:[#allocation2 + $0xa0] sm:$0x3] %vm680_vm2, %v2390_v33  ;;  %v870_v56 = vmul.f32 %v2586_v43, %v834_v48  ;;  %v871_v62 = vmul.f32 %v2586_v43, %v835_v51 }
  0x11   : > { %2274 = vmatprep.mubr.msk.f32.mxu0 %vm319_vm0, %v279_v1  ;;  %v282_v4 = vld [vmem:[%s2450_s8 + $0x18] sm:$0xff]  ;;  %v283_v5 = vld [vmem:[%s2450_s8 + $0x20] sm:$0xff]  ;;  %v284_v6 = vld [vmem:[%s2450_s8 + $0x28] sm:$0xff]  ;;  %700 = vst.msk [vmem:[#allocation2 + $0xa8] sm:$0xff] %vm677_vm1, %v2390_v33 }
  0x12   : > { %2275 = vmatmul.mubr.msk.f32.vlgmr.msra.gmra.mrb[0].mxu0 %vm319_vm0, %v280_v2  ;;  %v285_v7 = vld [vmem:[%s2450_s8 + $0x30] sm:$0xff]  ;;  %v286_v8 = vld [vmem:[%s2450_s8 + $0x38] sm:$0xff]  ;;  %v287_v9 = vld [vmem:[%s2450_s8 + $0x40] sm:$0xff]  ;;  %701 = vst.msk [vmem:[#allocation2 + $0xb0] sm:$0xff] %vm677_vm1, %v2390_v33 }
  0x13   : > { %2277 = vmatprep.mubr.msk.f32.mxu0 %vm319_vm0, %v281_v3  ;;  %v288_v10 = vld [vmem:[%s2450_s8 + $0x48] sm:$0xff]  ;;  %v289_v11 = vld [vmem:[%s2450_s8 + $0x50] sm:$0xff]  ;;  %v290_v12 = vld [vmem:[%s2450_s8 + $0x58] sm:$0xff]  ;;  %702 = vst.msk [vmem:[#allocation2 + $0xb8] sm:$0x3] %vm680_vm2, %v2390_v33 }
  0x14   : > { %v291_v13 = vld [vmem:[%s2450_s8 + $0x60] sm:$0xff]  ;;  %v292_v14 = vld [vmem:[%s2450_s8 + $0x68] sm:$0xff]  ;;  %v293_v15 = vld [vmem:[%s2450_s8 + $0x70] sm:$0xff]  ;;  %703 = vst.msk [vmem:[#allocation2 + $0xc0] sm:$0xff] %vm677_vm1, %v2390_v33 }
  0x15   : > { %v294_v16 = vld [vmem:[%s2450_s8 + $0x78] sm:$0xff]  ;;  %v295_v17 = vld [vmem:[%s2450_s8 + $0x80] sm:$0xff]  ;;  %v296_v18 = vld [vmem:[%s2450_s8 + $0x88] sm:$0xff]  ;;  %704 = vst.msk [vmem:[#allocation2 + $0xc8] sm:$0xff] %vm677_vm1, %v2390_v33 }
  0x16   : > { %2278 = vmatmul.mubr.msk.f32.gmra.mrb[2].mxu0 %vm319_vm0, %v282_v4  ;;  %v297_v19 = vld [vmem:[%s2450_s8 + $0x90] sm:$0xff]  ;;  %v298_v20 = vld [vmem:[%s2450_s8 + $0x98] sm:$0xff]  ;;  %v299_v21 = vld [vmem:[%s2450_s8 + $0xa0] sm:$0xff]  ;;  %705 = vst.msk [vmem:[#allocation2 + $0xd0] sm:$0x3] %vm680_vm2, %v2390_v33 }
  0x17   : > { %2280 = vmatprep.mubr.msk.f32.mxu0 %vm319_vm0, %v283_v5  ;;  %v300_v22 = vld [vmem:[%s2450_s8 + $0xa8] sm:$0xff]  ;;  %v301_v23 = vld [vmem:[%s2450_s8 + $0xb0] sm:$0xff]  ;;  %v302_v24 = vld [vmem:[%s2450_s8 + $0xb8] sm:$0xff]  ;;  %706 = vst.msk [vmem:[#allocation2 + $0xd8] sm:$0xff] %vm677_vm1, %v2390_v33  ;;  %v902_v5 = vadd.f32 %v870_v56, %v802_v55 }
  0x18   : > { %v303_v25 = vld [vmem:[%s2450_s8 + $0xc0] sm:$0xff]  ;;  %v304_v26 = vld [vmem:[%s2450_s8 + $0xc8] sm:$0xff]  ;;  %v305_v27 = vld [vmem:[%s2450_s8 + $0xd0] sm:$0xff]  ;;  %707 = vst.msk [vmem:[#allocation2 + $0xe0] sm:$0xff] %vm677_vm1, %v2390_v33 }
  0x19   : > { %v306_v28 = vld [vmem:[%s2450_s8 + $0xd8] sm:$0xff]  ;;  %v307_v29 = vld [vmem:[%s2450_s8 + $0xe0] sm:$0xff]  ;;  %v308_v30 = vld [vmem:[%s2450_s8 + $0xe8] sm:$0xff]  ;;  %708 = vst.msk [vmem:[#allocation2 + $0xe8] sm:$0x3] %vm680_vm2, %v2390_v33 }
  0x1a   : > { %2281 = vmatmul.mubr.msk.f32.gmra.mrb[4].mxu0 %vm319_vm0, %v284_v6  ;;  %v309_v31 = vld [vmem:[%s2450_s8 + $0xf0] sm:$0xff]  ;;  %v310_v32 = vld [vmem:[%s2450_s8 + $0xf8] sm:$0xff]  ;;  %709 = vst.msk [vmem:[#allocation2 + $0xf0] sm:$0xff] %vm677_vm1, %v2390_v33  ;;  %710 = vst.msk [vmem:[#allocation2 + $0xf8] sm:$0xff] %vm677_vm1, %v2390_v33 }
  0x1b   : > { %2283 = vmatprep.mubr.msk.f32.mxu0 %vm319_vm0, %v285_v7  ;;  %711 = vst.msk [vmem:[#allocation2 + $0x100] sm:$0x3] %vm680_vm2, %v2390_v33  ;;  %714 = vst.msk [vmem:[#allocation2 + $0x118] sm:$0x3] %vm680_vm2, %v2390_v33  ;;  %v767_v50 = vld [vmem:[#allocation2 + $0x8] sm:$0xff] }
  0x1c   : > { %712 = vst.msk [vmem:[#allocation2 + $0x108] sm:$0xff] %vm677_vm1, %v2390_v33  ;;  %713 = vst.msk [vmem:[#allocation2 + $0x110] sm:$0xff] %vm677_vm1, %v2390_v33  ;;  %v934_v60 = vld [vmem:[#allocation2 + $0x2] sm:$0xff]  ;;  %v803_v61 = vmul.f32 %v2584_v42, %v767_v50  ;;  %v935_v0 = vld [vmem:[#allocation2 + $0xa] sm:$0xff] }
  0x1d   : > { %715 = vst.msk [vmem:[#allocation2 + $0x120] sm:$0xff] %vm677_vm1, %v2390_v33  ;;  %716 = vst.msk [vmem:[#allocation2 + $0x128] sm:$0xff] %vm677_vm1, %v2390_v33  ;;  %v674_v2 = vld [vmem:[%s3423_s3 + $0x4] sm:$0x7]  ;;  %v970_v6 = vmul.f32 %v2592_v57, %v934_v60 }
  0x1e   : > { %2284 = vmatmul.mubr.msk.f32.gmra.mrb[6].mxu0 %vm319_vm0, %v286_v8  ;;  %717 = vst.msk [vmem:[#allocation2 + $0x130] sm:$0x3] %vm680_vm2, %v2390_v33  ;;  %720 = vst.msk [vmem:[#allocation2 + $0x148] sm:$0x3] %vm680_vm2, %v2390_v33 }
  0x1f   : > { %2286 = vmatprep.mubr.msk.f32.mxu0 %vm319_vm0, %v287_v9  ;;  %718 = vst.msk [vmem:[#allocation2 + $0x138] sm:$0xff] %vm677_vm1, %v2390_v33  ;;  %719 = vst.msk [vmem:[#allocation2 + $0x140] sm:$0xff] %vm677_vm1, %v2390_v33  ;;  %v903_v9 = vadd.f32 %v871_v62, %v803_v61 }
  0x20   : > { %721 = vst.msk [vmem:[#allocation2 + $0x150] sm:$0xff] %vm677_vm1, %v2390_v33  ;;  %722 = vst.msk [vmem:[#allocation2 + $0x158] sm:$0xff] %vm677_vm1, %v2390_v33 }
  0x21   : > { %723 = vst.msk [vmem:[#allocation2 + $0x160] sm:$0x3] %vm680_vm2, %v2390_v33  ;;  %726 = vst.msk [vmem:[#allocation2 + $0x178] sm:$0x3] %vm680_vm2, %v2390_v33 }
  0x22   : > { %2287 = vmatmul.mubr.msk.f32.gmra.mrb[8].mxu0 %vm319_vm0, %v288_v10  ;;  %724 = vst.msk [vmem:[#allocation2 + $0x168] sm:$0xff] %vm677_vm1, %v2390_v33  ;;  %725 = vst.msk [vmem:[#allocation2 + $0x170] sm:$0xff] %vm677_vm1, %v2390_v33  ;;  %v971_v10 = vmul.f32 %v2592_v57, %v935_v0 }
  0x23   : > { %2289 = vmatprep.mubr.msk.f32.mxu0 %vm319_vm0, %v289_v11  ;;  %727 = vst.msk [vmem:[#allocation2 + $0x180] sm:$0xff] %vm677_vm1, %v2390_v33  ;;  %728 = vst.msk [vmem:[#allocation2 + $0x188] sm:$0xff] %vm677_vm1, %v2390_v33 }
  0x24   : > { %729 = vst.msk [vmem:[#allocation2 + $0x190] sm:$0x3] %vm680_vm2, %v2390_v33  ;;  %732 = vst.msk [vmem:[#allocation2 + $0x1a8] sm:$0x3] %vm680_vm2, %v2390_v33 }
  0x25   : > { %730 = vst.msk [vmem:[#allocation2 + $0x198] sm:$0xff] %vm677_vm1, %v2390_v33  ;;  %731 = vst.msk [vmem:[#allocation2 + $0x1a0] sm:$0xff] %vm677_vm1, %v2390_v33 }
  0x26   : > { %2290 = vmatmul.mubr.msk.f32.gmra.mrb[10].mxu0 %vm319_vm0, %v290_v12  ;;  %v675_v12 = vld [vmem:[%s3423_s3 + $0x8] sm:$0x7] }
  0x27   : > { %2292 = vmatprep.mubr.msk.f32.mxu0 %vm319_vm0, %v291_v13  ;;  %v2613_v13 = vrot.slane %v674_v2, %v2573_v37 }
  0x2a   : > { %2293 = vmatmul.mubr.msk.f32.gmra.mrb[12].mxu0 %vm319_vm0, %v292_v14  ;;  %v2615_v14 = vrot.slane %v674_v2, %v868_v38 }
  0x2b   : > { %2295 = vmatprep.mubr.msk.f32.mxu0 %vm319_vm0, %v293_v15 }
  0x2e   : > { %2296 = vmatmul.mubr.msk.f32.gmra.mrb[14].mxu0 %vm319_vm0, %v294_v16  ;;  %v2617_v16 = vrot.slane %v674_v2, %v968_v44 }
  0x2f   : > { %2298 = vmatprep.mubr.msk.f32.mxu0 %vm319_vm0, %v295_v17 }
  0x32   : > { %2299 = vmatmul.mubr.msk.f32.gmra.mrb[16].mxu0 %vm319_vm0, %v296_v18 }
  0x33   : > { %2301 = vmatprep.mubr.msk.f32.mxu0 %vm319_vm0, %v297_v19  ;;  %v1002_v19 = vadd.f32 %v970_v6, %v902_v5 }
  0x36   : > { %2302 = vmatmul.mubr.msk.f32.gmra.mrb[18].mxu0 %vm319_vm0, %v298_v20 }
  0x37   : > { %2304 = vmatprep.mubr.msk.f32.mxu0 %vm319_vm0, %v299_v21 }
  0x3a   : > { %2305 = vmatmul.mubr.msk.f32.gmra.mrb[20].mxu0 %vm319_vm0, %v300_v22 }
  0x3b   : > { %2307 = vmatprep.mubr.msk.f32.mxu0 %vm319_vm0, %v301_v23 }
  0x3e   : > { %2308 = vmatmul.mubr.msk.f32.gmra.mrb[22].mxu0 %vm319_vm0, %v302_v24 }
  0x3f   : > { %2310 = vmatprep.mubr.msk.f32.mxu0 %vm319_vm0, %v303_v25 }
  0x42   : > { %2311 = vmatmul.mubr.msk.f32.gmra.mrb[24].mxu0 %vm319_vm0, %v304_v26  ;;  %v2623_v26 = vrot.slane %v675_v12, %v868_v38 }
  0x43   : > { %2313 = vmatprep.mubr.msk.f32.mxu0 %vm319_vm0, %v305_v27  ;;  %v2625_v27 = vrot.slane %v675_v12, %v968_v44 }
  0x46   : > { %2314 = vmatmul.mubr.msk.f32.gmra.mrb[26].mxu0 %vm319_vm0, %v306_v28  ;;  %v1003_v28 = vadd.f32 %v971_v10, %v903_v9 }
  0x47   : > { %2316 = vmatprep.mubr.msk.f32.mxu0 %vm319_vm0, %v307_v29 }
  0x4a   : > { %2317 = vmatmul.mubr.msk.f32.gmra.mrb[28].mxu0 %vm319_vm0, %v308_v30 }
  0x4b   : > { %2319 = vmatprep.mubr.msk.f32.mxu0 %vm319_vm0, %v309_v31 }
  0x4e   : > { %2320 = vmatmul.mubr.msk.f32.gmra.mrb[30].mxu0 %vm319_vm0, %v310_v32  ;;  %v2631_v32 = vrot.slane %v675_v12, %v2573_v37 }
  0xe5   : > { %v2276_v41 = vpop.f32.mrb[0].mxu0 }
  0xe6   : > { %v488_v45 = vadd.f32 %v2276_v41, %v2581_v40  ;;  %v482_v46 = vpop.f32.mrb[1].mxu0 }
  0xe7   : > { %v483_v49 = vadd.f32 %v2581_v40, %v482_v46 }
  0xe8   : > { %v642_v52 = vmax.f32 %v488_v45, 0.0 }
  0xe9   : > { %v641_v53 = vmax.f32 %v483_v49, 0.0  ;;  %v2279_v54 = vpop.f32.mrb[2].mxu0 }
  0xea   : > { %735 = vst.msk [vmem:[#allocation2 + $0x21] sm:$0xff] %vm677_vm1, %v642_v52  ;;  %v498_v58 = vadd.f32 %v2279_v54, %v2581_v40  ;;  %v492_v59 = vpop.f32.mrb[3].mxu0 }
  0xeb   : > { %734 = vst.msk [vmem:[#allocation2 + $0x19] sm:$0xff] %vm677_vm1, %v641_v53  ;;  %v493_v63 = vadd.f32 %v2581_v40, %v492_v59 }
  0xec   : > { %v644_v1 = vmax.f32 %v498_v58, 0.0 }
  0xed   : > { %v643_v3 = vmax.f32 %v493_v63, 0.0  ;;  %v2282_v4 = vpop.f32.mrb[4].mxu0 }
  0xee   : > { %737 = vst.msk [vmem:[#allocation2 + $0x39] sm:$0xff] %vm677_vm1, %v644_v1  ;;  %v508_v7 = vadd.f32 %v2282_v4, %v2581_v40  ;;  %v502_v8 = vpop.f32.mrb[5].mxu0 }
  0xef   : > { %736 = vst.msk [vmem:[#allocation2 + $0x31] sm:$0xff] %vm677_vm1, %v643_v3  ;;  %v503_v11 = vadd.f32 %v2581_v40, %v502_v8 }
  0xf0   : > { %v646_v15 = vmax.f32 %v508_v7, 0.0 }
  0xf1   : > { %v645_v17 = vmax.f32 %v503_v11, 0.0  ;;  %v2285_v18 = vpop.f32.mrb[6].mxu0  ;;  %v1135_v20 = vld [vmem:[#allocation2 + $0x21] sm:$0xff] }
  0xf2   : > { %v2619_v21 = vld [vmem:[#allocation2 + $0x22] sm:$0xff]  ;;  %739 = vst.msk [vmem:[#allocation2 + $0x51] sm:$0xff] %vm677_vm1, %v646_v15  ;;  %v518_v22 = vadd.f32 %v2285_v18, %v2581_v40  ;;  %v512_v23 = vpop.f32.mrb[7].mxu0  ;;  %v1034_v24 = vld [vmem:[#allocation2 + $0x18] sm:$0xff]  ;;  %v1171_v34 = vmul.f32 %v2615_v14, %v1135_v20  ;;  %v873_v53 = vmul.f32 %v1135_v20, %v2586_v43 }
  0xf3   : > { %v1134_v25 = vld [vmem:[#allocation2 + $0x19] sm:$0xff]  ;;  %738 = vst.msk [vmem:[#allocation2 + $0x49] sm:$0xff] %vm677_vm1, %v645_v17  ;;  %v513_v29 = vadd.f32 %v2581_v40, %v512_v23  ;;  %v1070_v30 = vmul.f32 %v2613_v13, %v1034_v24  ;;  %v1271_v39 = vmul.f32 %v2617_v16, %v2619_v21  ;;  %v804_v47 = vmul.f32 %v1034_v24, %v2584_v42 }
  0xf4   : > { %v1234_v31 = vld [vmem:[#allocation2 + $0x1a] sm:$0xff]  ;;  %v648_v35 = vmax.f32 %v518_v22, 0.0  ;;  %v1170_v36 = vmul.f32 %v2615_v14, %v1134_v25  ;;  %v872_v37 = vmul.f32 %v1134_v25, %v2586_v43 }
  0xf5   : > { %v1035_v33 = vld [vmem:[#allocation2 + $0x20] sm:$0xff]  ;;  %v647_v41 = vmax.f32 %v513_v29, 0.0  ;;  %v2288_v44 = vpop.f32.mrb[8].mxu0  ;;  %v1102_v45 = vadd.f32 %v1070_v30, %v1002_v19  ;;  %v1270_v50 = vmul.f32 %v2617_v16, %v1234_v31  ;;  %v972_v59 = vmul.f32 %v1234_v31, %v2592_v57 }
  0xf6   : > { %v1071_v38 = vmul.f32 %v2613_v13, %v1035_v33  ;;  %v2638_v46 = vld [vmem:[#allocation2 + $0x39] sm:$0xff]  ;;  %741 = vst.msk [vmem:[#allocation2 + $0x69] sm:$0xff] %vm677_vm1, %v648_v35  ;;  %v528_v48 = vadd.f32 %v2288_v44, %v2581_v40  ;;  %v522_v49 = vpop.f32.mrb[9].mxu0  ;;  %v2645_v51 = vld [vmem:[#allocation2 + $0x30] sm:$0xff]  ;;  %v805_v60 = vmul.f32 %v1035_v33, %v2584_v42  ;;  %v904_v6 = vadd.f32 %v872_v37, %v804_v47 }
  0xf7   : > { %740 = vst.msk [vmem:[#allocation2 + $0x61] sm:$0xff] %vm677_vm1, %v647_v41  ;;  %v523_v54 = vadd.f32 %v2581_v40, %v522_v49  ;;  %v1202_v55 = vadd.f32 %v1170_v36, %v1102_v45  ;;  %v2650_v56 = vld [vmem:[#allocation2 + $0x38] sm:$0xff]  ;;  %v1371_v62 = vmul.f32 %v2631_v32, %v2645_v51  ;;  %v1472_v1 = vmul.f32 %v2623_v26, %v2638_v46  ;;  %v2687_v36 = vld [vmem:[%s3424_s4] ss:$0 sm:$0xff] }
  0xf8   : > { %v1103_v52 = vadd.f32 %v1071_v38, %v1003_v28  ;;  %v2652_v58 = vld [vmem:[#allocation2 + $0x3a] sm:$0xff]  ;;  %v650_v61 = vmax.f32 %v528_v48, 0.0  ;;  %v2658_v63 = vld [vmem:[#allocation2 + $0x31] sm:$0xff]  ;;  %v1072_v7 = vmul.f32 %v2645_v51, %v2613_v13  ;;  %v1372_v11 = vmul.f32 %v2631_v32, %v2650_v56 }
  0xf9   : > { %v649_v2 = vmax.f32 %v523_v54, 0.0  ;;  %v2291_v3 = vpop.f32.mrb[10].mxu0  ;;  %v1302_v4 = vadd.f32 %v1270_v50, %v1202_v55  ;;  %v2662_v5 = vld [vmem:[#allocation2 + $0x32] sm:$0xff]  ;;  %v1572_v12 = vmul.f32 %v2625_v27, %v2652_v58  ;;  %v1471_v18 = vmul.f32 %v2623_v26, %v2658_v63 }
  0xfa   : > { %v1203_v0 = vadd.f32 %v1171_v34, %v1103_v52  ;;  %743 = vst.msk [vmem:[#allocation2 + $0x81] sm:$0xff] %vm677_vm1, %v650_v61  ;;  %v538_v8 = vadd.f32 %v2291_v3, %v2581_v40  ;;  %v532_v9 = vpop.f32.mrb[11].mxu0  ;;  %v1004_v19 = vadd.f32 %v972_v59, %v904_v6  ;;  %v1571_v22 = vmul.f32 %v2625_v27, %v2662_v5  ;;  %v2680_v31 = vld [vmem:[#allocation2 + $0x48] sm:$0xff] }
  0xfb   : > { %742 = vst.msk [vmem:[#allocation2 + $0x79] sm:$0xff] %vm677_vm1, %v649_v2  ;;  %v533_v15 = vadd.f32 %v2581_v40, %v532_v9  ;;  %v1403_v17 = vadd.f32 %v1371_v62, %v1302_v4  ;;  %v1172_v24 = vmul.f32 %v2658_v63, %v2615_v14  ;;  %v905_v33 = vadd.f32 %v873_v53, %v805_v60  ;;  %v2701_v53 = vld [vmem:[#allocation2 + $0x4a] sm:$0xff] }
  0xfc   : > { %v1303_v10 = vadd.f32 %v1271_v39, %v1203_v0  ;;  %v652_v20 = vmax.f32 %v538_v8, 0.0  ;;  %v1104_v30 = vadd.f32 %v1072_v7, %v1004_v19  ;;  %v2689_v39 = vld [vmem:[#allocation2 + $0x49] sm:$0xff]  ;;  %v973_v41 = vmul.f32 %v2619_v21, %v2592_v57 }
  0xfd   : > { %v651_v25 = vmax.f32 %v533_v15, 0.0  ;;  %v2294_v28 = vpop.f32.mrb[12].mxu0  ;;  %v1503_v29 = vadd.f32 %v1471_v18, %v1403_v17  ;;  %v1073_v44 = vmul.f32 %v2650_v56, %v2613_v13  ;;  %v1272_v48 = vmul.f32 %v2662_v5, %v2617_v16  ;;  %v2711_v4 = vld [vmem:[#allocation2 + $0x50] sm:$0xff] }
  0xfe   : > { %v1404_v23 = vadd.f32 %v1372_v11, %v1303_v10  ;;  %745 = vst.msk [vmem:[#allocation2 + $0x99] sm:$0xff] %vm677_vm1, %v652_v20  ;;  %v548_v34 = vadd.f32 %v2294_v28, %v2581_v40  ;;  %v542_v35 = vpop.f32.mrb[13].mxu0  ;;  %v1204_v37 = vadd.f32 %v1172_v24, %v1104_v30  ;;  %v1373_v52 = vmul.f32 %v2631_v32, %v2680_v31  ;;  %v2723_v15 = vld [vmem:[#allocation2 + $0x51] sm:$0xff] }
  0xff   : > { %744 = vst.msk [vmem:[#allocation2 + $0x91] sm:$0xff] %vm677_vm1, %v651_v25  ;;  %v543_v45 = vadd.f32 %v2581_v40, %v542_v35  ;;  %v1603_v47 = vadd.f32 %v1571_v22, %v1503_v29  ;;  %v1005_v21 = vadd.f32 %v973_v41, %v905_v33  ;;  %v1473_v61 = vmul.f32 %v2623_v26, %v2689_v39 }
 0x100   : > { %v1504_v38 = vadd.f32 %v1472_v1, %v1404_v23  ;;  %v654_v49 = vmax.f32 %v548_v34, 0.0  ;;  %v1304_v60 = vadd.f32 %v1272_v48, %v1204_v37  ;;  %v1173_v3 = vmul.f32 %v2638_v46, %v2615_v14  ;;  %v2729_v23 = vld [vmem:[#allocation2 + $0x52] sm:$0xff] }
 0x101   : > { %v653_v54 = vmax.f32 %v543_v45, 0.0  ;;  %v2297_v55 = vpop.f32.mrb[14].mxu0  ;;  %v1641_v59 = vadd.f32 %v2687_v36, %v1603_v47  ;;  %v1105_v2 = vadd.f32 %v1073_v44, %v1005_v21  ;;  %v1573_v8 = vmul.f32 %v2625_v27, %v2701_v53 }
 0x102   : > { %v1604_v50 = vadd.f32 %v1572_v12, %v1504_v38  ;;  %747 = vst.msk [vmem:[#allocation2 + $0xb1] sm:$0xff] %vm677_vm1, %v654_v49  ;;  %v558_v62 = vadd.f32 %v2297_v55, %v2581_v40  ;;  %v552_v0 = vpop.f32.mrb[15].mxu0  ;;  %v1405_v7 = vadd.f32 %v1373_v52, %v1304_v60  ;;  %v806_v9 = vmul.f32 %v2645_v51, %v2584_v42  ;;  %v2752_v55 = vld [vmem:[#allocation2 + $0x60] sm:$0xff] }
 0x103   : > { %746 = vst.msk [vmem:[#allocation2 + $0xa9] sm:$0xff] %vm677_vm1, %v653_v54  ;;  %v553_v6 = vadd.f32 %v2581_v40, %v552_v0  ;;  %2324 = vmatprep.mubr.msk.f32.mxu1 %vm677_vm1, %v1641_v59  ;;  %v1205_v11 = vadd.f32 %v1173_v3, %v1105_v2  ;;  %v1273_v12 = vmul.f32 %v2652_v58, %v2617_v16  ;;  %v2754_v59 = vld [vmem:[#allocation2 + $0x61] sm:$0xff] }
 0x104   : > { %v1642_v1 = vadd.f32 %v2687_v36, %v1604_v50  ;;  %v656_v10 = vmax.f32 %v558_v62, 0.0  ;;  %v874_v17 = vmul.f32 %v2658_v63, %v2586_v43  ;;  %v1505_v20 = vadd.f32 %v1473_v61, %v1405_v7 }
 0x105   : > { %v655_v18 = vmax.f32 %v553_v6, 0.0  ;;  %v2300_v19 = vpop.f32.mrb[16].mxu0  ;;  %v1374_v22 = vmul.f32 %v2631_v32, %v2711_v4  ;;  %v974_v51 = vmul.f32 %v2662_v5, %v2592_v57  ;;  %v1305_v28 = vadd.f32 %v1273_v12, %v1205_v11 }
 0x106   : > { %2325 = vmatmul.mubr.msk.f32.vlgmr.msra.gmra.mrb[0].mxu1 %vm677_vm1, %v1642_v1  ;;  %749 = vst.msk [vmem:[#allocation2 + $0xc9] sm:$0xff] %vm677_vm1, %v656_v10  ;;  %v568_v24 = vadd.f32 %v2300_v19, %v2581_v40  ;;  %v562_v25 = vpop.f32.mrb[17].mxu0  ;;  %v906_v29 = vadd.f32 %v874_v17, %v806_v9  ;;  %v1074_v63 = vmul.f32 %v2680_v31, %v2613_v13 }
 0x107   : > { %748 = vst.msk [vmem:[#allocation2 + $0xc1] sm:$0xff] %vm677_vm1, %v655_v18  ;;  %v563_v30 = vadd.f32 %v2581_v40, %v562_v25  ;;  %v1605_v33 = vadd.f32 %v1573_v8, %v1505_v20  ;;  %v1474_v34 = vmul.f32 %v2623_v26, %v2723_v15  ;;  %v1406_v5 = vadd.f32 %v1374_v22, %v1305_v28  ;;  %v1539_v18 = vld [vmem:[#allocation2 + $0x62] sm:$0xff] }
 0x108   : > { %v658_v35 = vmax.f32 %v568_v24, 0.0  ;;  %v1574_v38 = vmul.f32 %v2625_v27, %v2729_v23  ;;  %v1006_v41 = vadd.f32 %v974_v51, %v906_v29  ;;  %v807_v37 = vmul.f32 %v2650_v56, %v2584_v42  ;;  %v2775_v20 = vld [vmem:[#allocation2 + $0x68] sm:$0xff] }
 0x109   : > { %v657_v44 = vmax.f32 %v563_v30, 0.0  ;;  %v1643_v45 = vadd.f32 %v2687_v36, %v1605_v33  ;;  %v2303_v47 = vpop.f32.mrb[18].mxu0  ;;  %v875_v48 = vmul.f32 %v2638_v46, %v2586_v43  ;;  %v1506_v49 = vadd.f32 %v1474_v34, %v1406_v5  ;;  %v2785_v29 = vld [vmem:[#allocation2 + $0x69] sm:$0xff] }
 0x10a   : > { %751 = vst.msk [vmem:[#allocation2 + $0xe1] sm:$0xff] %vm677_vm1, %v658_v35  ;;  %v578_v50 = vadd.f32 %v2303_v47, %v2581_v40  ;;  %v572_v52 = vpop.f32.mrb[19].mxu0  ;;  %v1106_v21 = vadd.f32 %v1074_v63, %v1006_v41  ;;  %v1174_v54 = vmul.f32 %v2689_v39, %v2615_v14  ;;  %v975_v60 = vmul.f32 %v2652_v58, %v2592_v57  ;;  %v2789_v34 = vld [vmem:[#allocation2 + $0x6a] sm:$0xff] }
 0x10b   : > { %750 = vst.msk [vmem:[#allocation2 + $0xd9] sm:$0xff] %vm677_vm1, %v657_v44  ;;  %2327 = vmatprep.mubr.msk.f32.mxu1 %vm677_vm1, %v1643_v45  ;;  %v573_v46 = vadd.f32 %v2581_v40, %v572_v52  ;;  %v907_v56 = vadd.f32 %v875_v48, %v807_v37  ;;  %v1075_v61 = vmul.f32 %v2711_v4, %v2613_v13  ;;  %v2797_v45 = vld [vmem:[#allocation2 + $0x78] sm:$0xff] }
 0x10c   : > { %v1606_v62 = vadd.f32 %v1574_v38, %v1506_v49  ;;  %v660_v0 = vmax.f32 %v578_v50, 0.0  ;;  %v1206_v1 = vadd.f32 %v1174_v54, %v1106_v21  ;;  %v1274_v2 = vmul.f32 %v2701_v53, %v2617_v16 }
 0x10d   : > { %v659_v3 = vmax.f32 %v573_v46, 0.0  ;;  %v1375_v6 = vmul.f32 %v2631_v32, %v2752_v55  ;;  %v1475_v7 = vmul.f32 %v2623_v26, %v2754_v59  ;;  %v1007_v8 = vadd.f32 %v975_v60, %v907_v56  ;;  %v2306_v9 = vpop.f32.mrb[20].mxu0 }
 0x10e   : > { %v1644_v58 = vadd.f32 %v2687_v36, %v1606_v62  ;;  %753 = vst.msk [vmem:[#allocation2 + $0xf9] sm:$0xff] %vm677_vm1, %v660_v0  ;;  %v1306_v10 = vadd.f32 %v1274_v2, %v1206_v1  ;;  %v1175_v11 = vmul.f32 %v2723_v15, %v2615_v14  ;;  %v588_v12 = vadd.f32 %v2306_v9, %v2581_v40  ;;  %v582_v17 = vpop.f32.mrb[21].mxu0  ;;  %v2826_v9 = vld [vmem:[#allocation2 + $0x79] sm:$0xff] }
 0x10f   : > { %752 = vst.msk [vmem:[#allocation2 + $0xf1] sm:$0xff] %vm677_vm1, %v659_v3  ;;  %v1107_v19 = vadd.f32 %v1075_v61, %v1007_v8  ;;  %v583_v22 = vadd.f32 %v2581_v40, %v582_v17  ;;  %v808_v51 = vmul.f32 %v2680_v31, %v2584_v42  ;;  %v876_v24 = vmul.f32 %v2689_v39, %v2586_v43 }
 0x110   : > { %2328 = vmatmul.mubr.msk.f32.gmra.mrb[2].mxu1 %vm677_vm1, %v1644_v58  ;;  %v1407_v25 = vadd.f32 %v1375_v6, %v1306_v10  ;;  %v1275_v28 = vmul.f32 %v2729_v23, %v2617_v16  ;;  %v662_v63 = vmax.f32 %v588_v12, 0.0  ;;  %v976_v30 = vmul.f32 %v2701_v53, %v2592_v57  ;;  %v2828_v58 = vld [vmem:[#allocation2 + $0x7a] sm:$0xff] }
 0x111   : > { %v1207_v33 = vadd.f32 %v1175_v11, %v1107_v19  ;;  %v661_v35 = vmax.f32 %v583_v22, 0.0  ;;  %v908_v31 = vadd.f32 %v876_v24, %v808_v51  ;;  %v1076_v39 = vmul.f32 %v2752_v55, %v2613_v13  ;;  %v2309_v5 = vpop.f32.mrb[22].mxu0  ;;  %v2835_v22 = vld [vmem:[#allocation2 + $0x80] sm:$0xff] }
 0x112   : > { %v1507_v38 = vadd.f32 %v1475_v7, %v1407_v25  ;;  %v1575_v41 = vmul.f32 %v2625_v27, %v1539_v18  ;;  %v1376_v44 = vmul.f32 %v2631_v32, %v2775_v20  ;;  %755 = vst.msk [vmem:[#allocation2 + $0x111] sm:$0xff] %vm677_vm1, %v662_v63  ;;  %v592_v53 = vpop.f32.mrb[23].mxu0  ;;  %v1476_v37 = vmul.f32 %v2623_v26, %v2785_v29  ;;  %v2840_v63 = vld [vmem:[#allocation2 + $0x81] sm:$0xff] }
 0x113   : > { %v1307_v47 = vadd.f32 %v1275_v28, %v1207_v33  ;;  %754 = vst.msk [vmem:[#allocation2 + $0x109] sm:$0xff] %vm677_vm1, %v661_v35  ;;  %v1008_v48 = vadd.f32 %v976_v30, %v908_v31  ;;  %v809_v49 = vmul.f32 %v2711_v4, %v2584_v42  ;;  %v1576_v52 = vmul.f32 %v2625_v27, %v2789_v34 }
 0x114   : > { %v1607_v50 = vadd.f32 %v1575_v41, %v1507_v38  ;;  %v1176_v21 = vmul.f32 %v2754_v59, %v2615_v14  ;;  %v877_v54 = vmul.f32 %v2723_v15, %v2586_v43  ;;  %v1276_v60 = vmul.f32 %v1539_v18, %v2617_v16 }
 0x115   : > { %v1408_v46 = vadd.f32 %v1376_v44, %v1307_v47  ;;  %v1108_v56 = vadd.f32 %v1076_v39, %v1008_v48  ;;  %v1377_v61 = vmul.f32 %v2631_v32, %v2797_v45  ;;  %v2813_v62 = vpop.f32.mrb[24].mxu0  ;;  %v977_v1 = vmul.f32 %v2729_v23, %v2592_v57  ;;  %v2862_v48 = vld [vmem:[#allocation2 + $0x90] sm:$0xff] }
 0x116   : > { %v1645_v4 = vadd.f32 %v2687_v36, %v1607_v50  ;;  %v909_v0 = vadd.f32 %v877_v54, %v809_v49  ;;  %v1077_v2 = vmul.f32 %v2775_v20, %v2613_v13  ;;  %v2820_v3 = vpop.f32.mrb[25].mxu0  ;;  %v1177_v7 = vmul.f32 %v2785_v29, %v2615_v14 }
 0x117   : > { %v1508_v15 = vadd.f32 %v1476_v37, %v1408_v46  ;;  %v1208_v6 = vadd.f32 %v1176_v21, %v1108_v56  ;;  %v598_v8 = vadd.f32 %v2309_v5, %v2581_v40  ;;  %v593_v23 = vadd.f32 %v2581_v40, %v592_v53  ;;  %v2851_v5 = vld [vmem:[#allocation2 + $0x82] sm:$0xff] }
 0x118   : > { %2330 = vmatprep.mubr.msk.f32.mxu1 %vm677_vm1, %v1645_v4  ;;  %v1009_v10 = vadd.f32 %v977_v1, %v909_v0  ;;  %v810_v11 = vmul.f32 %v2752_v55, %v2584_v42  ;;  %v878_v12 = vmul.f32 %v2754_v59, %v2586_v43  ;;  %v978_v24 = vmul.f32 %v1539_v18, %v2592_v57 }
 0x119   : > { %v1608_v17 = vadd.f32 %v1576_v52, %v1508_v15  ;;  %v1308_v19 = vadd.f32 %v1276_v60, %v1208_v6  ;;  %v664_v51 = vmax.f32 %v598_v8, 0.0  ;;  %v2838_v25 = vpop.f32.mrb[26].mxu0  ;;  %v663_v30 = vmax.f32 %v593_v23, 0.0  ;;  %v2874_v60 = vld [vmem:[#allocation2 + $0x91] sm:$0xff] }
 0x11a   : > { %v1109_v28 = vadd.f32 %v1077_v2, %v1009_v10  ;;  %v910_v33 = vadd.f32 %v878_v12, %v810_v11  ;;  %v1078_v55 = vmul.f32 %v2797_v45, %v2613_v13  ;;  %v2844_v35 = vpop.f32.mrb[27].mxu0  ;;  %v1477_v39 = vmul.f32 %v2623_v26, %v2826_v9 }
 0x11b   : > { %v1646_v59 = vadd.f32 %v2687_v36, %v1608_v17  ;;  %v1409_v31 = vadd.f32 %v1377_v61, %v1308_v19  ;;  %v1577_v18 = vmul.f32 %v2625_v27, %v2828_v58  ;;  %757 = vst.msk [vmem:[#allocation2 + $0x129] sm:$0xff] %vm677_vm1, %v664_v51  ;;  %v1277_v41 = vmul.f32 %v2789_v34, %v2617_v16 }
 0x11c   : > { %v1209_v38 = vadd.f32 %v1177_v7, %v1109_v28  ;;  %v1378_v44 = vmul.f32 %v2631_v32, %v2835_v22  ;;  %756 = vst.msk [vmem:[#allocation2 + $0x121] sm:$0xff] %vm677_vm1, %v663_v30  ;;  %v1010_v53 = vadd.f32 %v978_v24, %v910_v33  ;;  %v1478_v37 = vmul.f32 %v2623_v26, %v2840_v63  ;;  %v1543_v24 = vld [vmem:[#allocation2 + $0x92] sm:$0xff] }
 0x11d   : > { %2331 = vmatmul.mubr.msk.f32.gmra.mrb[4].mxu1 %vm677_vm1, %v1646_v59  ;;  %v1509_v47 = vadd.f32 %v1477_v39, %v1409_v31  ;;  %v811_v49 = vmul.f32 %v2775_v20, %v2584_v42  ;;  %v879_v50 = vmul.f32 %v2785_v29, %v2586_v43  ;;  %v2868_v52 = vpop.f32.mrb[28].mxu0  ;;  %v1578_v54 = vmul.f32 %v2625_v27, %v2851_v5  ;;  %v2908_v31 = vld [vmem:[#allocation2 + $0x99] sm:$0xff] }
 0x11e   : > { %v1309_v21 = vadd.f32 %v1277_v41, %v1209_v38  ;;  %v1110_v46 = vadd.f32 %v1078_v55, %v1010_v53  ;;  %v1178_v56 = vmul.f32 %v2826_v9, %v2615_v14  ;;  %v2876_v61 = vpop.f32.mrb[29].mxu0  ;;  %v979_v20 = vmul.f32 %v2789_v34, %v2592_v57  ;;  %v2910_v38 = vld [vmem:[#allocation2 + $0x9a] sm:$0xff] }
 0x11f   : > { %v1609_v4 = vadd.f32 %v1577_v18, %v1509_v47  ;;  %v911_v0 = vadd.f32 %v879_v50, %v811_v49  ;;  %v1079_v29 = vmul.f32 %v2835_v22, %v2613_v13  ;;  %v1278_v15 = vmul.f32 %v2828_v58, %v2617_v16  ;;  %v2922_v50 = vld [vmem:[#allocation2 + $0xa8] sm:$0xff] }
 0x120   : > { %v1410_v1 = vadd.f32 %v1378_v44, %v1309_v21  ;;  %v1210_v2 = vadd.f32 %v1178_v56, %v1110_v46  ;;  %v1379_v6 = vmul.f32 %v2631_v32, %v2862_v48  ;;  %v1479_v8 = vmul.f32 %v2623_v26, %v2874_v60 }
 0x121   : > { %v1647_v7 = vadd.f32 %v2687_v36, %v1609_v4  ;;  %v1011_v10 = vadd.f32 %v979_v20, %v911_v0  ;;  %v608_v34 = vadd.f32 %v2813_v62, %v2581_v40  ;;  %v2891_v23 = vpop.f32.mrb[30].mxu0  ;;  %v603_v17 = vadd.f32 %v2581_v40, %v2820_v3  ;;  %v2902_v62 = vld [vmem:[#allocation2 + $0x98] sm:$0xff] }
 0x122   : > { %v1510_v11 = vadd.f32 %v1478_v37, %v1410_v1  ;;  %v1310_v12 = vadd.f32 %v1278_v15, %v1210_v2  ;;  %v812_v19 = vmul.f32 %v2797_v45, %v2584_v42  ;;  %v2897_v51 = vpop.f32.mrb[31].mxu0  ;;  %v1179_v30 = vmul.f32 %v2840_v63, %v2615_v14 }
 0x123   : > { %2333 = vmatprep.mubr.msk.f32.mxu1 %vm677_vm1, %v1647_v7  ;;  %v1111_v28 = vadd.f32 %v1079_v29, %v1011_v10  ;;  %v666_v33 = vmax.f32 %v608_v34, 0.0  ;;  %v880_v55 = vmul.f32 %v2826_v9, %v2586_v43  ;;  %v1279_v45 = vmul.f32 %v2851_v5, %v2617_v16 }
 0x124   : > { %v1610_v59 = vadd.f32 %v1578_v54, %v1510_v11  ;;  %v1411_v3 = vadd.f32 %v1379_v6, %v1310_v12  ;;  %v665_v39 = vmax.f32 %v603_v17, 0.0  ;;  %v980_v44 = vmul.f32 %v2828_v58, %v2592_v57  ;;  %v1445_v12 = vld [vmem:[#allocation2 + $0xa9] sm:$0xff] }
 0x125   : > { %v1211_v18 = vadd.f32 %v1179_v30, %v1111_v28  ;;  %759 = vst.msk [vmem:[#allocation2 + $0x141] sm:$0xff] %vm677_vm1, %v666_v33  ;;  %v912_v41 = vadd.f32 %v880_v55, %v812_v19  ;;  %v1080_v9 = vmul.f32 %v2862_v48, %v2613_v13  ;;  %v1579_v37 = vmul.f32 %v2625_v27, %v1543_v24  ;;  %v2948_v17 = vld [vmem:[#allocation2 + $0xaa] sm:$0xff] }
 0x126   : > { %v1648_v53 = vadd.f32 %v2687_v36, %v1610_v59  ;;  %v1511_v47 = vadd.f32 %v1479_v8, %v1411_v3  ;;  %v1380_v49 = vmul.f32 %v2631_v32, %v2902_v62  ;;  %758 = vst.msk [vmem:[#allocation2 + $0x139] sm:$0xff] %vm677_vm1, %v665_v39  ;;  %v1480_v54 = vmul.f32 %v2623_v26, %v2908_v31  ;;  %v2956_v59 = vld [vmem:[#allocation2 + $0xb0] sm:$0xff] }
 0x127   : > { %v1311_v21 = vadd.f32 %v1279_v45, %v1211_v18  ;;  %v1012_v58 = vadd.f32 %v980_v44, %v912_v41  ;;  %v813_v46 = vmul.f32 %v2835_v22, %v2584_v42  ;;  %v1580_v4 = vmul.f32 %v2625_v27, %v2910_v38  ;;  %v2959_v39 = vld [vmem:[#allocation2 + $0xb1] sm:$0xff] }
 0x128   : > { %2334 = vmatmul.mubr.msk.f32.gmra.mrb[6].mxu1 %vm677_vm1, %v1648_v53  ;;  %v1611_v56 = vadd.f32 %v1579_v37, %v1511_v47  ;;  %v1180_v0 = vmul.f32 %v2874_v60, %v2615_v14  ;;  %v881_v20 = vmul.f32 %v2840_v63, %v2586_v43  ;;  %v1280_v2 = vmul.f32 %v1543_v24, %v2617_v16  ;;  %v2967_v53 = vld [vmem:[#allocation2 + $0xb2] sm:$0xff] }
 0x129   : > { %v1412_v29 = vadd.f32 %v1380_v49, %v1311_v21  ;;  %v1112_v1 = vadd.f32 %v1080_v9, %v1012_v58  ;;  %v1381_v15 = vmul.f32 %v2631_v32, %v2922_v50  ;;  %v981_v7 = vmul.f32 %v2851_v5, %v2592_v57  ;;  %v2978_v58 = vld [vmem:[#allocation2 + $0xc0] sm:$0xff] }
 0x12a   : > { %v1649_v22 = vadd.f32 %v2687_v36, %v1611_v56  ;;  %v913_v6 = vadd.f32 %v881_v20, %v813_v46  ;;  %v1081_v8 = vmul.f32 %v2902_v62, %v2613_v13  ;;  %v1181_v63 = vmul.f32 %v2908_v31, %v2615_v14 }
 0x12b   : > { %v1512_v10 = vadd.f32 %v1480_v54, %v1412_v29  ;;  %v1212_v34 = vadd.f32 %v1180_v0, %v1112_v1  ;;  %v618_v11 = vadd.f32 %v2838_v25, %v2581_v40  ;;  %v613_v5 = vadd.f32 %v2581_v40, %v2844_v35  ;;  %v2987_v1 = vld [vmem:[#allocation2 + $0xc1] sm:$0xff] }
 0x12c   : > { %2336 = vmatprep.mubr.msk.f32.mxu1 %vm677_vm1, %v1649_v22  ;;  %v1013_v19 = vadd.f32 %v981_v7, %v913_v6  ;;  %v814_v28 = vmul.f32 %v2862_v48, %v2584_v42  ;;  %v882_v30 = vmul.f32 %v2874_v60, %v2586_v43  ;;  %v982_v3 = vmul.f32 %v1543_v24, %v2592_v57 }
 0x12d   : > { %v1612_v33 = vadd.f32 %v1580_v4, %v1512_v10  ;;  %v1312_v55 = vadd.f32 %v1280_v2, %v1212_v34  ;;  %v668_v25 = vmax.f32 %v618_v11, 0.0  ;;  %v667_v18 = vmax.f32 %v613_v5, 0.0 }
 0x12e   : > { %v1113_v45 = vadd.f32 %v1081_v8, %v1013_v19  ;;  %v914_v41 = vadd.f32 %v882_v30, %v814_v28  ;;  %v1082_v35 = vmul.f32 %v2922_v50, %v2613_v13  ;;  %v1481_v60 = vmul.f32 %v2623_v26, %v1445_v12  ;;  %v1547_v30 = vld [vmem:[#allocation2 + $0xc2] sm:$0xff] }
 0x12f   : > { %v1650_v48 = vadd.f32 %v2687_v36, %v1612_v33  ;;  %v1413_v44 = vadd.f32 %v1381_v15, %v1312_v55  ;;  %v1581_v9 = vmul.f32 %v2625_v27, %v2948_v17  ;;  %761 = vst.msk [vmem:[#allocation2 + $0x159] sm:$0xff] %vm677_vm1, %v668_v25  ;;  %v1281_v47 = vmul.f32 %v2910_v38, %v2617_v16  ;;  %v3009_v25 = vld [vmem:[#allocation2 + $0xc8] sm:$0xff] }
 0x130   : > { %v1213_v24 = vadd.f32 %v1181_v63, %v1113_v45  ;;  %v1382_v37 = vmul.f32 %v2631_v32, %v2956_v59  ;;  %760 = vst.msk [vmem:[#allocation2 + $0x151] sm:$0xff] %vm677_vm1, %v667_v18  ;;  %v1014_v49 = vadd.f32 %v982_v3, %v914_v41  ;;  %v1482_v54 = vmul.f32 %v2623_v26, %v2959_v39  ;;  %v3014_v41 = vld [vmem:[#allocation2 + $0xc9] sm:$0xff] }
 0x131   : > { %2337 = vmatmul.mubr.msk.f32.gmra.mrb[8].mxu1 %vm677_vm1, %v1650_v48  ;;  %v1513_v21 = vadd.f32 %v1481_v60, %v1413_v44  ;;  %v815_v46 = vmul.f32 %v2902_v62, %v2584_v42  ;;  %v883_v56 = vmul.f32 %v2908_v31, %v2586_v43  ;;  %v1582_v0 = vmul.f32 %v2625_v27, %v2967_v53  ;;  %v3016_v48 = vld [vmem:[#allocation2 + $0xca] sm:$0xff] }
 0x132   : > { %v1313_v4 = vadd.f32 %v1281_v47, %v1213_v24  ;;  %v1114_v20 = vadd.f32 %v1082_v35, %v1014_v49  ;;  %v1182_v29 = vmul.f32 %v1445_v12, %v2615_v14  ;;  %v983_v22 = vmul.f32 %v2910_v38, %v2592_v57  ;;  %v3028_v49 = vld [vmem:[#allocation2 + $0xd8] sm:$0xff] }
 0x133   : > { %v1613_v2 = vadd.f32 %v1581_v9, %v1513_v21  ;;  %v915_v15 = vadd.f32 %v883_v56, %v815_v46  ;;  %v1083_v62 = vmul.f32 %v2956_v59, %v2613_v13  ;;  %v1282_v31 = vmul.f32 %v2948_v17, %v2617_v16 }
 0x134   : > { %v1414_v6 = vadd.f32 %v1382_v37, %v1313_v4  ;;  %v1214_v7 = vadd.f32 %v1182_v29, %v1114_v20  ;;  %v1383_v8 = vmul.f32 %v2631_v32, %v2978_v58  ;;  %v1483_v34 = vmul.f32 %v2623_v26, %v2987_v1 }
 0x135   : > { %v1651_v10 = vadd.f32 %v2687_v36, %v1613_v2  ;;  %v1015_v63 = vadd.f32 %v983_v22, %v915_v15  ;;  %v628_v38 = vadd.f32 %v2868_v52, %v2581_v40  ;;  %v623_v5 = vadd.f32 %v2581_v40, %v2876_v61 }
 0x136   : > { %v1514_v11 = vadd.f32 %v1482_v54, %v1414_v6  ;;  %v1314_v19 = vadd.f32 %v1282_v31, %v1214_v7  ;;  %v816_v28 = vmul.f32 %v2922_v50, %v2584_v42  ;;  %v1183_v55 = vmul.f32 %v2959_v39, %v2615_v14 }
 0x137   : > { %2339 = vmatprep.mubr.msk.f32.mxu1 %vm677_vm1, %v1651_v10  ;;  %v1115_v33 = vadd.f32 %v1083_v62, %v1015_v63  ;;  %v670_v3 = vmax.f32 %v628_v38, 0.0  ;;  %v884_v52 = vmul.f32 %v1445_v12, %v2586_v43  ;;  %v1283_v61 = vmul.f32 %v2967_v53, %v2617_v16 }
 0x138   : > { %v1614_v45 = vadd.f32 %v1582_v0, %v1514_v11  ;;  %v1415_v18 = vadd.f32 %v1383_v8, %v1314_v19  ;;  %v669_v50 = vmax.f32 %v623_v5, 0.0  ;;  %v984_v60 = vmul.f32 %v2948_v17, %v2592_v57 }
 0x139   : > { %v1215_v35 = vadd.f32 %v1183_v55, %v1115_v33  ;;  %763 = vst.msk [vmem:[#allocation2 + $0x171] sm:$0xff] %vm677_vm1, %v670_v3  ;;  %v916_v44 = vadd.f32 %v884_v52, %v816_v28  ;;  %v1084_v12 = vmul.f32 %v2978_v58, %v2613_v13  ;;  %v1583_v47 = vmul.f32 %v2625_v27, %v1547_v30  ;;  %v1549_v28 = vld [vmem:[#allocation2 + $0xda] sm:$0xff] }
 0x13a   : > { %v1652_v9 = vadd.f32 %v2687_v36, %v1614_v45  ;;  %v1515_v24 = vadd.f32 %v1483_v34, %v1415_v18  ;;  %v1384_v37 = vmul.f32 %v2631_v32, %v3009_v25  ;;  %762 = vst.msk [vmem:[#allocation2 + $0x169] sm:$0xff] %vm677_vm1, %v669_v50  ;;  %v1484_v54 = vmul.f32 %v2623_v26, %v3014_v41  ;;  %v1449_v34 = vld [vmem:[#allocation2 + $0xd9] sm:$0xff] }
 0x13b   : > { %v1315_v21 = vadd.f32 %v1283_v61, %v1215_v35  ;;  %v1016_v17 = vadd.f32 %v984_v60, %v916_v44  ;;  %v817_v46 = vmul.f32 %v2956_v59, %v2584_v42  ;;  %v1584_v4 = vmul.f32 %v2625_v27, %v3016_v48  ;;  %v1350_v3 = vld [vmem:[#allocation2 + $0xe0] sm:$0xff] }
 0x13c   : > { %2340 = vmatmul.mubr.msk.f32.gmra.mrb[10].mxu1 %vm677_vm1, %v1652_v9  ;;  %v1615_v56 = vadd.f32 %v1583_v47, %v1515_v24  ;;  %v1184_v0 = vmul.f32 %v2987_v1, %v2615_v14  ;;  %v885_v20 = vmul.f32 %v2959_v39, %v2586_v43  ;;  %v1284_v15 = vmul.f32 %v1547_v30, %v2617_v16  ;;  %v1450_v61 = vld [vmem:[#allocation2 + $0xe1] sm:$0xff] }
 0x13d   : > { %v1416_v29 = vadd.f32 %v1384_v37, %v1315_v21  ;;  %v1116_v2 = vadd.f32 %v1084_v12, %v1016_v17  ;;  %v1385_v22 = vmul.f32 %v2631_v32, %v3028_v49  ;;  %v985_v6 = vmul.f32 %v2967_v53, %v2592_v57  ;;  %v1550_v12 = vld [vmem:[#allocation2 + $0xe2] sm:$0xff]  ;;  %v1351_v17 = vld [vmem:[#allocation2 + $0xf0] sm:$0xff] }
 0x13e   : > { %v1653_v59 = vadd.f32 %v2687_v36, %v1615_v56  ;;  %v917_v62 = vadd.f32 %v885_v20, %v817_v46  ;;  %v1085_v7 = vmul.f32 %v3009_v25, %v2613_v13  ;;  %v1185_v39 = vmul.f32 %v3014_v41, %v2615_v14  ;;  %v1451_v56 = vld [vmem:[#allocation2 + $0xf1] sm:$0xff] }
 0x13f   : > { %v1516_v31 = vadd.f32 %v1484_v54, %v1416_v29  ;;  %v1216_v8 = vadd.f32 %v1184_v0, %v1116_v2  ;;  %v638_v10 = vadd.f32 %v2891_v23, %v2581_v40  ;;  %v633_v38 = vadd.f32 %v2581_v40, %v2897_v51 }
 0x140   : > { %2342 = vmatprep.mubr.msk.f32.mxu1 %vm677_vm1, %v1653_v59  ;;  %v1017_v63 = vadd.f32 %v985_v6, %v917_v62  ;;  %v818_v53 = vmul.f32 %v2978_v58, %v2584_v42  ;;  %v886_v11 = vmul.f32 %v2987_v1, %v2586_v43  ;;  %v986_v55 = vmul.f32 %v1547_v30, %v2592_v57 }
 0x141   : > { %v1616_v19 = vadd.f32 %v1584_v4, %v1516_v31  ;;  %v1316_v5 = vadd.f32 %v1284_v15, %v1216_v8  ;;  %v672_v33 = vmax.f32 %v638_v10, 0.0  ;;  %v671_v52 = vmax.f32 %v633_v38, 0.0  ;;  %v3083_v15 = vld [vmem:[#allocation2 + $0xf2] sm:$0xff] }
 0x142   : > { %v1117_v23 = vadd.f32 %v1085_v7, %v1017_v63  ;;  %v918_v45 = vadd.f32 %v886_v11, %v818_v53  ;;  %v1086_v18 = vmul.f32 %v3028_v49, %v2613_v13  ;;  %v1485_v58 = vmul.f32 %v2623_v26, %v1449_v34  ;;  %v1352_v8 = vld [vmem:[#allocation2 + $0xf8] sm:$0xff] }
 0x143   : > { %v1654_v40 = vadd.f32 %v2687_v36, %v1616_v19  ;;  %v1417_v51 = vadd.f32 %v1385_v22, %v1316_v5  ;;  %765 = vst.msk [vmem:[#allocation2 + $0x189] sm:$0xff] %vm677_vm1, %v672_v33  ;;  %v1585_v1 = vmul.f32 %v2625_v27, %v1549_v28  ;;  %v1285_v30 = vmul.f32 %v3016_v48, %v2617_v16 }
 0x144   : > { %v1217_v50 = vadd.f32 %v1185_v39, %v1117_v23  ;;  %764 = vst.msk [vmem:[#allocation2 + $0x181] sm:$0xff] %vm677_vm1, %v671_v52  ;;  %v1018_v35 = vadd.f32 %v986_v55, %v918_v45  ;;  %v1386_v60 = vmul.f32 %v2631_v32, %v1350_v3  ;;  %v819_v9 = vmul.f32 %v3009_v25, %v2584_v42 }
 0x145   : > { %2343 = vmatmul.mubr.msk.f32.gmra.mrb[12].mxu1 %vm677_vm1, %v1654_v40  ;;  %v1517_v44 = vadd.f32 %v1485_v58, %v1417_v51  ;;  %v887_v24 = vmul.f32 %v3014_v41, %v2586_v43  ;;  %v1486_v37 = vmul.f32 %v2623_v26, %v1450_v61  ;;  %v1186_v54 = vmul.f32 %v1449_v34, %v2615_v14  ;;  %v1552_v40 = vld [vmem:[#allocation2 + $0xfa] sm:$0xff]  ;;  %v3101_v58 = vld [vmem:[#allocation2 + $0x108] sm:$0xff] }
 0x146   : > { %v1317_v47 = vadd.f32 %v1285_v30, %v1217_v50  ;;  %v1118_v21 = vadd.f32 %v1086_v18, %v1018_v35  ;;  %v987_v0 = vmul.f32 %v3016_v48, %v2592_v57  ;;  %v1087_v20 = vmul.f32 %v1350_v3, %v2613_v13 }
 0x147   : > { %v1617_v46 = vadd.f32 %v1585_v1, %v1517_v44  ;;  %v919_v4 = vadd.f32 %v887_v24, %v819_v9  ;;  %v1586_v25 = vmul.f32 %v2625_v27, %v1550_v12  ;;  %v1286_v41 = vmul.f32 %v1549_v28, %v2617_v16  ;;  %v1553_v9 = vld [vmem:[#allocation2 + $0x10a] sm:$0xff] }
 0x148   : > { %v1418_v29 = vadd.f32 %v1386_v60, %v1317_v47  ;;  %v1218_v2 = vadd.f32 %v1186_v54, %v1118_v21  ;;  %v1387_v59 = vmul.f32 %v2631_v32, %v1351_v17  ;;  %v820_v6 = vmul.f32 %v3028_v49, %v2584_v42  ;;  %v1452_v49 = vld [vmem:[#allocation2 + $0xf9] sm:$0xff]  ;;  %v1453_v60 = vld [vmem:[#allocation2 + $0x109] sm:$0xff] }
 0x149   : > { %v1655_v22 = vadd.f32 %v2687_v36, %v1617_v46  ;;  %v1019_v62 = vadd.f32 %v987_v0, %v919_v4  ;;  %v1487_v31 = vmul.f32 %v2623_v26, %v1451_v56  ;;  %v888_v39 = vmul.f32 %v1449_v34, %v2586_v43 }
 0x14a   : > { %v1518_v7 = vadd.f32 %v1486_v37, %v1418_v29  ;;  %v1318_v48 = vadd.f32 %v1286_v41, %v1218_v2  ;;  %v1587_v10 = vmul.f32 %v2625_v27, %v3083_v15  ;;  %v1187_v38 = vmul.f32 %v1450_v61, %v2615_v14  ;;  %v3118_v2 = vld [vmem:[#allocation2 + $0x110] sm:$0xff] }
 0x14b   : > { %2345 = vmatprep.mubr.msk.f32.mxu1 %vm677_vm1, %v1655_v22  ;;  %v1119_v63 = vadd.f32 %v1087_v20, %v1019_v62  ;;  %v988_v53 = vmul.f32 %v1549_v28, %v2592_v57  ;;  %v920_v5 = vadd.f32 %v888_v39, %v820_v6  ;;  %v1088_v33 = vmul.f32 %v1351_v17, %v2613_v13 }
 0x14c   : > { %v1618_v11 = vadd.f32 %v1586_v25, %v1518_v7  ;;  %v1419_v19 = vadd.f32 %v1387_v59, %v1318_v48  ;;  %v1287_v23 = vmul.f32 %v1550_v12, %v2617_v16  ;;  %v1388_v34 = vmul.f32 %v2631_v32, %v1352_v8  ;;  %v1454_v7 = vld [vmem:[#allocation2 + $0x111] sm:$0xff] }
 0x14d   : > { %v1219_v55 = vadd.f32 %v1187_v38, %v1119_v63  ;;  %v821_v52 = vmul.f32 %v1350_v3, %v2584_v42  ;;  %v1020_v51 = vadd.f32 %v988_v53, %v920_v5  ;;  %v889_v28 = vmul.f32 %v1450_v61, %v2586_v43 }
 0x14e   : > { %v1656_v45 = vadd.f32 %v2687_v36, %v1618_v11  ;;  %v1519_v18 = vadd.f32 %v1487_v31, %v1419_v19  ;;  %v1488_v50 = vmul.f32 %v2623_v26, %v1452_v49  ;;  %v1188_v30 = vmul.f32 %v1451_v56, %v2615_v14 }
 0x14f   : > { %v1319_v1 = vadd.f32 %v1287_v23, %v1219_v55  ;;  %v989_v35 = vmul.f32 %v1550_v12, %v2592_v57  ;;  %v1120_v3 = vadd.f32 %v1088_v33, %v1020_v51  ;;  %v921_v24 = vadd.f32 %v889_v28, %v821_v52  ;;  %v3135_v33 = vld [vmem:[#allocation2 + $0x120] sm:$0xff] }
 0x150   : > { %2346 = vmatmul.mubr.msk.f32.gmra.mrb[14].mxu1 %vm677_vm1, %v1656_v45  ;;  %v1619_v44 = vadd.f32 %v1587_v10, %v1519_v18  ;;  %v1089_v47 = vmul.f32 %v1352_v8, %v2613_v13  ;;  %v1588_v21 = vmul.f32 %v2625_v27, %v1552_v40  ;;  %v1288_v61 = vmul.f32 %v3083_v15, %v2617_v16 }
 0x151   : > { %v1420_v37 = vadd.f32 %v1388_v34, %v1319_v1  ;;  %v1389_v54 = vmul.f32 %v2631_v32, %v3101_v58  ;;  %v1220_v46 = vadd.f32 %v1188_v30, %v1120_v3  ;;  %v1021_v4 = vadd.f32 %v989_v35, %v921_v24  ;;  %v1455_v35 = vld [vmem:[#allocation2 + $0x121] sm:$0xff] }
 0x152   : > { %v1657_v12 = vadd.f32 %v2687_v36, %v1619_v44  ;;  %v822_v0 = vmul.f32 %v1351_v17, %v2584_v42  ;;  %v1489_v29 = vmul.f32 %v2623_v26, %v1453_v60  ;;  %v1589_v25 = vmul.f32 %v2625_v27, %v1553_v9  ;;  %v3124_v17 = vld [vmem:[#allocation2 + $0x112] sm:$0xff]  ;;  %v1555_v44 = vld [vmem:[#allocation2 + $0x122] sm:$0xff] }
 0x153   : > { %v1520_v20 = vadd.f32 %v1488_v50, %v1420_v37  ;;  %v890_v41 = vmul.f32 %v1451_v56, %v2586_v43  ;;  %v1320_v22 = vadd.f32 %v1288_v61, %v1220_v46  ;;  %v1121_v59 = vadd.f32 %v1089_v47, %v1021_v4  ;;  %v3153_v61 = vld [vmem:[#allocation2 + $0x128] sm:$0xff] }
 0x154   : > { %2348 = vmatprep.mubr.msk.f32.mxu1 %vm677_vm1, %v1657_v12  ;;  %v1189_v62 = vmul.f32 %v1452_v49, %v2615_v14  ;;  %v1289_v6 = vmul.f32 %v1552_v40, %v2617_v16  ;;  %v990_v39 = vmul.f32 %v3083_v15, %v2592_v57  ;;  %v1090_v10 = vmul.f32 %v3101_v58, %v2613_v13  ;;  %v1456_v4 = vld [vmem:[#allocation2 + $0x129] sm:$0xff] }
 0x155   : > { %v1620_v48 = vadd.f32 %v1588_v21, %v1520_v20  ;;  %v922_v31 = vadd.f32 %v890_v41, %v822_v0  ;;  %v1421_v56 = vadd.f32 %v1389_v54, %v1320_v22  ;;  %v1390_v38 = vmul.f32 %v2631_v32, %v3118_v2 }
 0x156   : > { %v1221_v63 = vadd.f32 %v1189_v62, %v1121_v59  ;;  %v823_v53 = vmul.f32 %v1352_v8, %v2584_v42  ;;  %v1490_v19 = vmul.f32 %v2623_v26, %v1454_v7  ;;  %v891_v55 = vmul.f32 %v1452_v49, %v2586_v43  ;;  %v1556_v59 = vld [vmem:[#allocation2 + $0x12a] sm:$0xff] }
 0x157   : > { %v1658_v11 = vadd.f32 %v2687_v36, %v1620_v48  ;;  %v1022_v5 = vadd.f32 %v990_v39, %v922_v31  ;;  %v1521_v15 = vadd.f32 %v1489_v29, %v1421_v56  ;;  %v1590_v34 = vmul.f32 %v2625_v27, %v3124_v17 }
 0x158   : > { %v1321_v23 = vadd.f32 %v1289_v6, %v1221_v63  ;;  %v1190_v52 = vmul.f32 %v1453_v60, %v2615_v14  ;;  %v923_v8 = vadd.f32 %v891_v55, %v823_v53  ;;  %v991_v18 = vmul.f32 %v1552_v40, %v2592_v57  ;;  %v1357_v53 = vld [vmem:[#allocation2 + $0x138] sm:$0xff] }
 0x159   : > { %2349 = vmatmul.mubr.msk.f32.gmra.mrb[16].mxu1 %vm677_vm1, %v1658_v11  ;;  %v1122_v45 = vadd.f32 %v1090_v10, %v1022_v5  ;;  %v1091_v51 = vmul.f32 %v3118_v2, %v2613_v13  ;;  %v1621_v28 = vadd.f32 %v1589_v25, %v1521_v15  ;;  %v1290_v49 = vmul.f32 %v1553_v9, %v2617_v16 }
 0x15a   : > { %v1422_v1 = vadd.f32 %v1390_v38, %v1321_v23  ;;  %v1391_v50 = vmul.f32 %v2631_v32, %v3135_v33  ;;  %v1023_v3 = vadd.f32 %v991_v18, %v923_v8  ;;  %v824_v24 = vmul.f32 %v3101_v58, %v2584_v42 }
 0x15b   : > { %v1222_v30 = vadd.f32 %v1190_v52, %v1122_v45  ;;  %v892_v47 = vmul.f32 %v1453_v60, %v2586_v43  ;;  %v1659_v40 = vadd.f32 %v2687_v36, %v1621_v28  ;;  %v1191_v21 = vmul.f32 %v1454_v7, %v2615_v14  ;;  %v1557_v52 = vld [vmem:[#allocation2 + $0x13a] sm:$0xff] }
 0x15c   : > { %v1522_v37 = vadd.f32 %v1490_v19, %v1422_v1  ;;  %v992_v54 = vmul.f32 %v1553_v9, %v2592_v57  ;;  %v1123_v46 = vadd.f32 %v1091_v51, %v1023_v3  ;;  %v1092_v20 = vmul.f32 %v3135_v33, %v2613_v13 }
 0x15d   : > { %v1322_v12 = vadd.f32 %v1290_v49, %v1222_v30  ;;  %v924_v0 = vadd.f32 %v892_v47, %v824_v24  ;;  %2351 = vmatprep.mubr.msk.f32.mxu1 %vm677_vm1, %v1659_v40  ;;  %v1491_v60 = vmul.f32 %v2623_v26, %v1455_v35  ;;  %v1591_v29 = vmul.f32 %v2625_v27, %v1555_v44 }
 0x15e   : > { %v1622_v58 = vadd.f32 %v1590_v34, %v1522_v37  ;;  %v1291_v25 = vmul.f32 %v3124_v17, %v2617_v16  ;;  %v1223_v22 = vadd.f32 %v1191_v21, %v1123_v46  ;;  %v1392_v9 = vmul.f32 %v2631_v32, %v3153_v61  ;;  %v1457_v34 = vld [vmem:[#allocation2 + $0x139] sm:$0xff]  ;;  %v1458_v21 = vld [vmem:[#allocation2 + $0x141] sm:$0xff] }
 0x15f   : > { %v1423_v41 = vadd.f32 %v1391_v50, %v1322_v12  ;;  %v1024_v62 = vadd.f32 %v992_v54, %v924_v0  ;;  %v1492_v48 = vmul.f32 %v2623_v26, %v1456_v4  ;;  %v825_v31 = vmul.f32 %v3118_v2, %v2584_v42  ;;  %v1358_v50 = vld [vmem:[#allocation2 + $0x140] sm:$0xff] }
 0x160   : > { %v1660_v6 = vadd.f32 %v2687_v36, %v1622_v58  ;;  %v893_v39 = vmul.f32 %v1454_v7, %v2586_v43  ;;  %v1323_v56 = vadd.f32 %v1291_v25, %v1223_v22  ;;  %v1192_v38 = vmul.f32 %v1455_v35, %v2615_v14  ;;  %v1558_v58 = vld [vmem:[#allocation2 + $0x142] sm:$0xff] }
 0x161   : > { %v1523_v10 = vadd.f32 %v1491_v60, %v1423_v41  ;;  %v1124_v63 = vadd.f32 %v1092_v20, %v1024_v62  ;;  %v1592_v11 = vmul.f32 %v2625_v27, %v1556_v59  ;;  %v993_v36 = vmul.f32 %v3124_v17, %v2592_v57  ;;  %v3185_v17 = vld [vmem:[%s3424_s4] ss:$0 sm:$0xff]  ;;  %v1359_v62 = vld [vmem:[#allocation2 + $0x150] sm:$0xff] }
 0x162   : > { %2352 = vmatmul.mubr.msk.f32.gmra.mrb[18].mxu1 %vm677_vm1, %v1660_v6  ;;  %v925_v19 = vadd.f32 %v893_v39, %v825_v31  ;;  %v1093_v5 = vmul.f32 %v3153_v61, %v2613_v13  ;;  %v1424_v55 = vadd.f32 %v1392_v9, %v1323_v56  ;;  %v1292_v15 = vmul.f32 %v1555_v44, %v2617_v16 }
 0x163   : > { %v1623_v2 = vadd.f32 %v1591_v29, %v1523_v10  ;;  %v1224_v7 = vadd.f32 %v1192_v38, %v1124_v63  ;;  %v1393_v23 = vmul.f32 %v2631_v32, %v1357_v53  ;;  %v826_v8 = vmul.f32 %v3135_v33, %v2584_v42  ;;  %v3207_v38 = vld [vmem:[#allocation2 + $0x152] sm:$0xff] }
 0x164   : > { %v1025_v45 = vadd.f32 %v993_v36, %v925_v19  ;;  %v894_v18 = vmul.f32 %v1455_v35, %v2586_v43  ;;  %v1524_v28 = vadd.f32 %v1492_v48, %v1424_v55  ;;  %v1193_v49 = vmul.f32 %v1456_v4, %v2615_v14  ;;  %v1459_v48 = vld [vmem:[#allocation2 + $0x151] sm:$0xff] }
 0x165   : > { %v1661_v51 = vadd.f32 %v3185_v17, %v1623_v2  ;;  %v1324_v1 = vadd.f32 %v1292_v15, %v1224_v7  ;;  %v994_v24 = vmul.f32 %v1555_v44, %v2592_v57  ;;  %v1094_v33 = vmul.f32 %v1357_v53, %v2613_v13  ;;  %v1360_v7 = vld [vmem:[#allocation2 + $0x158] sm:$0xff] }
 0x166   : > { %v1125_v30 = vadd.f32 %v1093_v5, %v1025_v45  ;;  %v926_v3 = vadd.f32 %v894_v18, %v826_v8  ;;  %v1624_v35 = vadd.f32 %v1592_v11, %v1524_v28  ;;  %v1493_v40 = vmul.f32 %v2623_v26, %v1457_v34 }
 0x167   : > { %2354 = vmatprep.mubr.msk.f32.mxu1 %vm677_vm1, %v1661_v51  ;;  %v1425_v47 = vadd.f32 %v1393_v23, %v1324_v1  ;;  %v1593_v37 = vmul.f32 %v2625_v27, %v1557_v52  ;;  %v1293_v12 = vmul.f32 %v1556_v59, %v2617_v16  ;;  %v1394_v46 = vmul.f32 %v2631_v32, %v1358_v50 }
 0x168   : > { %v1225_v54 = vadd.f32 %v1193_v49, %v1125_v30  ;;  %v1026_v0 = vadd.f32 %v994_v24, %v926_v3  ;;  %v1662_v20 = vadd.f32 %v3185_v17, %v1624_v35  ;;  %v827_v60 = vmul.f32 %v3153_v61, %v2584_v42 }
 0x169   : > { %v1525_v44 = vadd.f32 %v1493_v40, %v1425_v47  ;;  %v895_v29 = vmul.f32 %v1456_v4, %v2586_v43  ;;  %v1494_v41 = vmul.f32 %v2623_v26, %v1458_v21  ;;  %v1194_v9 = vmul.f32 %v1457_v34, %v2615_v14  ;;  %v1560_v47 = vld [vmem:[#allocation2 + $0x15a] sm:$0xff] }
 0x16a   : > { %v1325_v25 = vadd.f32 %v1293_v12, %v1225_v54  ;;  %v1126_v22 = vadd.f32 %v1094_v33, %v1026_v0  ;;  %2355 = vmatmul.mubr.msk.f32.gmra.mrb[20].mxu1 %vm677_vm1, %v1662_v20  ;;  %v995_v39 = vmul.f32 %v1556_v59, %v2592_v57  ;;  %v1095_v10 = vmul.f32 %v1358_v50, %v2613_v13 }
 0x16b   : > { %v1625_v6 = vadd.f32 %v1593_v37, %v1525_v44  ;;  %v927_v31 = vadd.f32 %v895_v29, %v827_v60  ;;  %v1594_v61 = vmul.f32 %v2625_v27, %v1558_v58  ;;  %v1294_v63 = vmul.f32 %v1557_v52, %v2617_v16  ;;  %v3224_v37 = vld [vmem:[#allocation2 + $0x168] sm:$0xff] }
 0x16c   : > { %v1426_v56 = vadd.f32 %v1394_v46, %v1325_v25  ;;  %v1226_v4 = vadd.f32 %v1194_v9, %v1126_v22  ;;  %v1395_v19 = vmul.f32 %v2631_v32, %v1359_v62  ;;  %v828_v5 = vmul.f32 %v1357_v53, %v2584_v42  ;;  %v1460_v53 = vld [vmem:[#allocation2 + $0x159] sm:$0xff]  ;;  %v1461_v44 = vld [vmem:[#allocation2 + $0x169] sm:$0xff] }
 0x16d   : > { %v1663_v11 = vadd.f32 %v3185_v17, %v1625_v6  ;;  %v1027_v36 = vadd.f32 %v995_v39, %v927_v31  ;;  %v1495_v59 = vmul.f32 %v2623_v26, %v1459_v48  ;;  %v896_v15 = vmul.f32 %v1457_v34, %v2586_v43  ;;  %v1561_v60 = vld [vmem:[#allocation2 + $0x16a] sm:$0xff] }
 0x16e   : > { %v1526_v2 = vadd.f32 %v1494_v41, %v1426_v56  ;;  %v1326_v55 = vadd.f32 %v1294_v63, %v1226_v4  ;;  %v1595_v23 = vmul.f32 %v2625_v27, %v3207_v38  ;;  %v1195_v8 = vmul.f32 %v1458_v21, %v2615_v14  ;;  %v3241_v4 = vld [vmem:[#allocation2 + $0x170] sm:$0xff] }
 0x16f   : > { %2357 = vmatprep.mubr.msk.f32.mxu1 %vm677_vm1, %v1663_v11  ;;  %v1127_v45 = vadd.f32 %v1095_v10, %v1027_v36  ;;  %v996_v18 = vmul.f32 %v1557_v52, %v2592_v57  ;;  %v928_v1 = vadd.f32 %v896_v15, %v828_v5  ;;  %v1096_v49 = vmul.f32 %v1359_v62, %v2613_v13 }
 0x170   : > { %v1626_v51 = vadd.f32 %v1594_v61, %v1526_v2  ;;  %v1427_v28 = vadd.f32 %v1395_v19, %v1326_v55  ;;  %v1295_v3 = vmul.f32 %v1558_v58, %v2617_v16  ;;  %v1396_v34 = vmul.f32 %v2631_v32, %v1360_v7  ;;  %v1462_v2 = vld [vmem:[#allocation2 + $0x171] sm:$0xff] }
 0x171   : > { %v1227_v30 = vadd.f32 %v1195_v8, %v1127_v45  ;;  %v829_v24 = vmul.f32 %v1358_v50, %v2584_v42  ;;  %v1028_v40 = vadd.f32 %v996_v18, %v928_v1  ;;  %v897_v52 = vmul.f32 %v1458_v21, %v2586_v43 }
 0x172   : > { %v1664_v33 = vadd.f32 %v3185_v17, %v1626_v51  ;;  %v1527_v35 = vadd.f32 %v1495_v59, %v1427_v28  ;;  %v1496_v12 = vmul.f32 %v2623_v26, %v1460_v53  ;;  %v1196_v46 = vmul.f32 %v1459_v48, %v2615_v14 }
 0x173   : > { %v1327_v54 = vadd.f32 %v1295_v3, %v1227_v30  ;;  %v997_v0 = vmul.f32 %v1558_v58, %v2592_v57  ;;  %v1128_v50 = vadd.f32 %v1096_v49, %v1028_v40  ;;  %v929_v29 = vadd.f32 %v897_v52, %v829_v24  ;;  %v1363_v49 = vld [vmem:[#allocation2 + $0x180] sm:$0xff] }
 0x174   : > { %2358 = vmatmul.mubr.msk.f32.gmra.mrb[22].mxu1 %vm677_vm1, %v1664_v33  ;;  %v1627_v20 = vadd.f32 %v1595_v23, %v1527_v35  ;;  %v1097_v25 = vmul.f32 %v1360_v7, %v2613_v13  ;;  %v1596_v22 = vmul.f32 %v2625_v27, %v1560_v47  ;;  %v1296_v21 = vmul.f32 %v3207_v38, %v2617_v16 }
 0x175   : > { %v1428_v41 = vadd.f32 %v1396_v34, %v1327_v54  ;;  %v1397_v9 = vmul.f32 %v2631_v32, %v3224_v37  ;;  %v1228_v6 = vadd.f32 %v1196_v46, %v1128_v50  ;;  %v1029_v31 = vadd.f32 %v997_v0, %v929_v29  ;;  %v1463_v0 = vld [vmem:[#allocation2 + $0x181] sm:$0xff] }
 0x176   : > { %v1665_v58 = vadd.f32 %v3185_v17, %v1627_v20  ;;  %v830_v39 = vmul.f32 %v1359_v62, %v2584_v42  ;;  %v1497_v56 = vmul.f32 %v2623_v26, %v1461_v44  ;;  %v1597_v61 = vmul.f32 %v2625_v27, %v1561_v60  ;;  %v3247_v62 = vld [vmem:[#allocation2 + $0x172] sm:$0xff]  ;;  %v1563_v20 = vld [vmem:[#allocation2 + $0x182] sm:$0xff] }
 0x177   : > { %v1528_v10 = vadd.f32 %v1496_v12, %v1428_v41  ;;  %v898_v63 = vmul.f32 %v1459_v48, %v2586_v43  ;;  %v1328_v11 = vadd.f32 %v1296_v21, %v1228_v6  ;;  %v1129_v19 = vadd.f32 %v1097_v25, %v1029_v31  ;;  %v1364_v21 = vld [vmem:[#allocation2 + $0x188] sm:$0xff] }
 0x178   : > { %2360 = vmatprep.mubr.msk.f32.mxu1 %vm677_vm1, %v1665_v58  ;;  %v1197_v36 = vmul.f32 %v1460_v53, %v2615_v14  ;;  %v1297_v5 = vmul.f32 %v1560_v47, %v2617_v16  ;;  %v998_v15 = vmul.f32 %v3207_v38, %v2592_v57  ;;  %v1098_v23 = vmul.f32 %v3224_v37, %v2613_v13  ;;  %v1464_v31 = vld [vmem:[#allocation2 + $0x189] sm:$0xff] }
 0x179   : > { %v1628_v55 = vadd.f32 %v1596_v22, %v1528_v10  ;;  %v930_v59 = vadd.f32 %v898_v63, %v830_v39  ;;  %v1429_v48 = vadd.f32 %v1397_v9, %v1328_v11  ;;  %v1398_v8 = vmul.f32 %v2631_v32, %v3241_v4 }
 0x17a   : > { %v1229_v45 = vadd.f32 %v1197_v36, %v1129_v19  ;;  %v831_v18 = vmul.f32 %v1360_v7, %v2584_v42  ;;  %v1498_v28 = vmul.f32 %v2623_v26, %v1462_v2  ;;  %v899_v30 = vmul.f32 %v1460_v53, %v2586_v43 }
 0x17b   : > { %v1666_v51 = vadd.f32 %v3185_v17, %v1628_v55  ;;  %v1030_v1 = vadd.f32 %v998_v15, %v930_v59  ;;  %v1529_v3 = vadd.f32 %v1497_v56, %v1429_v48  ;;  %v1598_v34 = vmul.f32 %v2625_v27, %v3247_v62  ;;  %v1365_v55 = vld [vmem:[#allocation2 + $0x198] sm:$0xff] }
 0x17c   : > { %v1329_v38 = vadd.f32 %v1297_v5, %v1229_v45  ;;  %v1198_v24 = vmul.f32 %v1461_v44, %v2615_v14  ;;  %v931_v35 = vadd.f32 %v899_v30, %v831_v18  ;;  %v999_v7 = vmul.f32 %v1560_v47, %v2592_v57  ;;  %v1564_v45 = vld [vmem:[#allocation2 + $0x18a] sm:$0xff] }
 0x17d   : > { %2361 = vmatmul.mubr.msk.f32.gmra.mrb[24].mxu1 %vm677_vm1, %v1666_v51  ;;  %v1130_v33 = vadd.f32 %v1098_v23, %v1030_v1  ;;  %v1099_v40 = vmul.f32 %v3241_v4, %v2613_v13  ;;  %v1629_v52 = vadd.f32 %v1597_v61, %v1529_v3  ;;  %v1298_v53 = vmul.f32 %v1561_v60, %v2617_v16 }
 0x17e   : > { %v1430_v54 = vadd.f32 %v1398_v8, %v1329_v38  ;;  %v1399_v12 = vmul.f32 %v2631_v32, %v1363_v49  ;;  %v1031_v50 = vadd.f32 %v999_v7, %v931_v35  ;;  %v832_v29 = vmul.f32 %v3224_v37, %v2584_v42  ;;  %v1565_v38 = vld [vmem:[#allocation2 + $0x19a] sm:$0xff] }
 0x17f   : > { %v1230_v46 = vadd.f32 %v1198_v24, %v1130_v33  ;;  %v900_v25 = vmul.f32 %v1461_v44, %v2586_v43  ;;  %v1667_v47 = vadd.f32 %v3185_v17, %v1629_v52  ;;  %v1199_v22 = vmul.f32 %v1462_v2, %v2615_v14 }
 0x180   : > { %v1530_v41 = vadd.f32 %v1498_v28, %v1430_v54  ;;  %v1000_v9 = vmul.f32 %v1561_v60, %v2592_v57  ;;  %v1131_v6 = vadd.f32 %v1099_v40, %v1031_v50  ;;  %v1100_v10 = vmul.f32 %v1363_v49, %v2613_v13  ;;  %v1465_v28 = vld [vmem:[#allocation2 + $0x199] sm:$0xff] }
 0x181   : > { %v1330_v58 = vadd.f32 %v1298_v53, %v1230_v46  ;;  %v932_v39 = vadd.f32 %v900_v25, %v832_v29  ;;  %2363 = vmatprep.mubr.msk.f32.mxu1 %vm677_vm1, %v1667_v47  ;;  %v1499_v37 = vmul.f32 %v2623_v26, %v1463_v0  ;;  %v1599_v44 = vmul.f32 %v2625_v27, %v1563_v20  ;;  %v1366_v40 = vld [vmem:[#allocation2 + $0x1a0] sm:$0xff] }
 0x182   : > { %v1630_v56 = vadd.f32 %v1598_v34, %v1530_v41  ;;  %v1299_v61 = vmul.f32 %v3247_v62, %v2617_v16  ;;  %v1231_v11 = vadd.f32 %v1199_v22, %v1131_v6  ;;  %v1400_v60 = vmul.f32 %v2631_v32, %v1364_v21  ;;  %v1466_v53 = vld [vmem:[#allocation2 + $0x1a1] sm:$0xff] }
 0x183   : > { %v1431_v63 = vadd.f32 %v1399_v12, %v1330_v58  ;;  %v1032_v19 = vadd.f32 %v1000_v9, %v932_v39  ;;  %v1500_v5 = vmul.f32 %v2623_v26, %v1464_v31  ;;  %v833_v59 = vmul.f32 %v3241_v4, %v2584_v42  ;;  %v1566_v29 = vld [vmem:[#allocation2 + $0x1a2] sm:$0xff] }
 0x184   : > { %v1668_v36 = vadd.f32 %v3185_v17, %v1630_v56  ;;  %v901_v15 = vmul.f32 %v1462_v2, %v2586_v43  ;;  %v1331_v48 = vadd.f32 %v1299_v61, %v1231_v11  ;;  %v1200_v18 = vmul.f32 %v1463_v0, %v2615_v14 }
 0x185   : > { %v1531_v23 = vadd.f32 %v1499_v37, %v1431_v63  ;;  %v1132_v8 = vadd.f32 %v1100_v10, %v1032_v19  ;;  %v1300_v51 = vmul.f32 %v1563_v20, %v2617_v16  ;;  %v1001_v49 = vmul.f32 %v3247_v62, %v2592_v57 }
 0x186   : > { %2364 = vmatmul.mubr.msk.f32.gmra.mrb[26].mxu1 %vm677_vm1, %v1668_v36  ;;  %v933_v1 = vadd.f32 %v901_v15, %v833_v59  ;;  %v1101_v30 = vmul.f32 %v1364_v21, %v2613_v13  ;;  %v1432_v4 = vadd.f32 %v1400_v60, %v1331_v48  ;;  %v1401_v2 = vmul.f32 %v2631_v32, %v1365_v55 }
 0x187   : > { %v1631_v42 = vadd.f32 %v1599_v44, %v1531_v23  ;;  %v1232_v43 = vadd.f32 %v1200_v18, %v1132_v8  ;;  %v1600_v3 = vmul.f32 %v2625_v27, %v1564_v45  ;;  %v1501_v7 = vmul.f32 %v2623_v26, %v1465_v28 }
 0x188   : > { %v1033_v34 = vadd.f32 %v1001_v49, %v933_v1  ;;  %v1532_v33 = vadd.f32 %v1500_v5, %v1432_v4  ;;  %v1201_v57 = vmul.f32 %v1464_v31, %v2615_v14  ;;  %v1601_v54 = vmul.f32 %v2625_v27, %v1565_v38 }
 0x189   : > { %v1669_v24 = vadd.f32 %v3185_v17, %v1631_v42  ;;  %v1332_v35 = vadd.f32 %v1300_v51, %v1232_v43  ;;  %v1301_v46 = vmul.f32 %v1564_v45, %v2617_v16  ;;  %v1402_v0 = vmul.f32 %v2631_v32, %v1366_v40 }
 0x18a   : > { %v1133_v52 = vadd.f32 %v1101_v30, %v1033_v34  ;;  %v1632_v13 = vadd.f32 %v1600_v3, %v1532_v33  ;;  %v1502_v14 = vmul.f32 %v2623_v26, %v1466_v53  ;;  %v1602_v22 = vmul.f32 %v2625_v27, %v1566_v29  ;;  %v3312_v26 = vld [vmem:[%s3426_s6] ss:$0 sm:$0xff] }
 0x18b   : > { %2366 = vmatprep.mubr.msk.f32.mxu1 %vm677_vm1, %v1669_v24  ;;  %v1433_v62 = vadd.f32 %v1401_v2, %v1332_v35 }
 0x18c   : > { %v1233_v12 = vadd.f32 %v1201_v57, %v1133_v52  ;;  %v1670_v20 = vadd.f32 %v3185_v17, %v1632_v13 }
 0x18d   : > { %v1533_v50 = vadd.f32 %v1501_v7, %v1433_v62 }
 0x18e   : > { %v1333_v25 = vadd.f32 %v1301_v46, %v1233_v12  ;;  %2367 = vmatmul.mubr.msk.f32.gmra.mrb[28].mxu1 %vm677_vm1, %v1670_v20 }
 0x18f   : > { %v1633_v47 = vadd.f32 %v1601_v54, %v1533_v50 }
 0x190   : > { %v1434_v41 = vadd.f32 %v1402_v0, %v1333_v25 }
 0x191   : > { %v1671_v21 = vadd.f32 %v3185_v17, %v1633_v47 }
 0x192   : > { %v1534_v9 = vadd.f32 %v1502_v14, %v1434_v41 }
 0x193   : > { %2369 = vmatprep.mubr.msk.f32.mxu1 %vm677_vm1, %v1671_v21 }
 0x194   : > { %v1634_v16 = vadd.f32 %v1602_v22, %v1534_v9 }
 0x196   : > { %v1672_v32 = vadd.f32 %v3185_v17, %v1634_v16 }
 0x198   : > { %2370 = vmatmul.mubr.msk.f32.gmra.mrb[30].mxu1 %vm677_vm1, %v1672_v32 }
 0x1d9   : > { %v2326_v58 = vpop.f32.mrb[0].mxu1 }
 0x1da   : > { %v1853_v6 = vadd.f32 %v2326_v58, %v3312_v26  ;;  %v1847_v31 = vpop.f32.mrb[1].mxu1 }
 0x1db   : > { %v1848_v27 = vadd.f32 %v3312_v26, %v1847_v31 }
 0x1dc   : > { %v2007_v17 = vmax.f32 %v1853_v6, 0.0 }
 0x1dd   : > { %v2006_v39 = vmax.f32 %v1848_v27, 0.0 }
 0x1de   : > { %2039 = vst.msk [vmem:[%s3320_s30 + $0x8] sm:$0xff] %vm677_vm1, %v2007_v17 }
 0x1df   : > { %2038 = vst.msk [vmem:[%s3320_s30] sm:$0xff] %vm677_vm1, %v2006_v39 }
 0x1e3   : > { %v2329_v10 = vpop.f32.mrb[2].mxu1 }
 0x1e4   : > { %v1863_v56 = vadd.f32 %v2329_v10, %v3312_v26  ;;  %v1857_v37 = vpop.f32.mrb[3].mxu1 }
 0x1e5   : > { %v1858_v44 = vadd.f32 %v3312_v26, %v1857_v37 }
 0x1e6   : > { %v2009_v61 = vmax.f32 %v1863_v56, 0.0 }
 0x1e7   : > { %v2008_v63 = vmax.f32 %v1858_v44, 0.0 }
 0x1e8   : > { %2041 = vst.msk [vmem:[%s3320_s30 + $0x18] sm:$0xff] %vm677_vm1, %v2009_v61 }
 0x1e9   : > { %2040 = vst.msk [vmem:[%s3320_s30 + $0x10] sm:$0xff] %vm677_vm1, %v2008_v63 }
 0x1f0   : > { %v2332_v11 = vpop.f32.mrb[4].mxu1 }
 0x1f1   : > { %v1873_v60 = vadd.f32 %v2332_v11, %v3312_v26  ;;  %v1867_v19 = vpop.f32.mrb[5].mxu1 }
 0x1f2   : > { %v1868_v36 = vadd.f32 %v3312_v26, %v1867_v19 }
 0x1f3   : > { %v2011_v5 = vmax.f32 %v1873_v60, 0.0 }
 0x1f4   : > { %v2010_v55 = vmax.f32 %v1868_v36, 0.0 }
 0x1f5   : > { %2043 = vst.msk [vmem:[%s3320_s30 + $0x28] sm:$0xff] %vm677_vm1, %v2011_v5 }
 0x1f6   : > { %2042 = vst.msk [vmem:[%s3320_s30 + $0x20] sm:$0xff] %vm677_vm1, %v2010_v55 }
 0x1fb   : > { %v2335_v59 = vpop.f32.mrb[6].mxu1 }
 0x1fc   : > { %v1883_v15 = vadd.f32 %v2335_v59, %v3312_v26  ;;  %v1877_v23 = vpop.f32.mrb[7].mxu1 }
 0x1fd   : > { %v1878_v48 = vadd.f32 %v3312_v26, %v1877_v23 }
 0x1fe   : > { %v2013_v45 = vmax.f32 %v1883_v15, 0.0 }
 0x1ff   : > { %v2012_v8 = vmax.f32 %v1878_v48, 0.0 }
 0x200   : > { %2045 = vst.msk [vmem:[%s3320_s30 + $0x38] sm:$0xff] %vm677_vm1, %v2013_v45 }
 0x201   : > { %2044 = vst.msk [vmem:[%s3320_s30 + $0x30] sm:$0xff] %vm677_vm1, %v2012_v8 }
 0x204   : > { %v2338_v18 = vpop.f32.mrb[8].mxu1 }
 0x205   : > { %v1893_v51 = vadd.f32 %v2338_v18, %v3312_v26  ;;  %v1887_v28 = vpop.f32.mrb[9].mxu1 }
 0x206   : > { %v1888_v1 = vadd.f32 %v3312_v26, %v1887_v28 }
 0x207   : > { %v2015_v49 = vmax.f32 %v1893_v51, 0.0 }
 0x208   : > { %v2014_v30 = vmax.f32 %v1888_v1, 0.0 }
 0x209   : > { %2047 = vst.msk [vmem:[%s3320_s30 + $0x48] sm:$0xff] %vm677_vm1, %v2015_v49 }
 0x20a   : > { %2046 = vst.msk [vmem:[%s3320_s30 + $0x40] sm:$0xff] %vm677_vm1, %v2014_v30 }
 0x20f   : > { %v2341_v42 = vpop.f32.mrb[10].mxu1 }
 0x210   : > { %v1903_v4 = vadd.f32 %v2341_v42, %v3312_v26  ;;  %v1897_v43 = vpop.f32.mrb[11].mxu1 }
 0x211   : > { %v1898_v2 = vadd.f32 %v3312_v26, %v1897_v43 }
 0x212   : > { %v2017_v3 = vmax.f32 %v1903_v4, 0.0 }
 0x213   : > { %v2016_v38 = vmax.f32 %v1898_v2, 0.0 }
 0x214   : > { %2049 = vst.msk [vmem:[%s3320_s30 + $0x58] sm:$0xff] %vm677_vm1, %v2017_v3 }
 0x215   : > { %2048 = vst.msk [vmem:[%s3320_s30 + $0x50] sm:$0xff] %vm677_vm1, %v2016_v38 }
 0x218   : > { %v2344_v34 = vpop.f32.mrb[12].mxu1 }
 0x219   : > { %v1913_v24 = vadd.f32 %v2344_v34, %v3312_v26  ;;  %v1907_v33 = vpop.f32.mrb[13].mxu1 }
 0x21a   : > { %v1908_v35 = vadd.f32 %v3312_v26, %v1907_v33 }
 0x21b   : > { %v2019_v7 = vmax.f32 %v1913_v24, 0.0 }
 0x21c   : > { %v2018_v40 = vmax.f32 %v1908_v35, 0.0 }
 0x21d   : > { %2051 = vst.msk [vmem:[%s3320_s30 + $0x68] sm:$0xff] %vm677_vm1, %v2019_v7 }
 0x21e   : > { %2050 = vst.msk [vmem:[%s3320_s30 + $0x60] sm:$0xff] %vm677_vm1, %v2018_v40 }
 0x223   : > { %v2347_v52 = vpop.f32.mrb[14].mxu1 }
 0x224   : > { %v1923_v57 = vadd.f32 %v2347_v52, %v3312_v26  ;;  %v1917_v13 = vpop.f32.mrb[15].mxu1 }
 0x225   : > { %v1918_v62 = vadd.f32 %v3312_v26, %v1917_v13 }
 0x226   : > { %v2021_v54 = vmax.f32 %v1923_v57, 0.0 }
 0x227   : > { %v2020_v53 = vmax.f32 %v1918_v62, 0.0 }
 0x228   : > { %2053 = vst.msk [vmem:[%s3320_s30 + $0x78] sm:$0xff] %vm677_vm1, %v2021_v54 }
 0x229   : > { %2052 = vst.msk [vmem:[%s3320_s30 + $0x70] sm:$0xff] %vm677_vm1, %v2020_v53 }
 0x22c   : > { %v2350_v12 = vpop.f32.mrb[16].mxu1 }
 0x22d   : > { %v1933_v46 = vadd.f32 %v2350_v12, %v3312_v26  ;;  %v1927_v0 = vpop.f32.mrb[17].mxu1 }
 0x22e   : > { %v1928_v20 = vadd.f32 %v3312_v26, %v1927_v0 }
 0x22f   : > { %v2023_v50 = vmax.f32 %v1933_v46, 0.0 }
 0x230   : > { %v2022_v29 = vmax.f32 %v1928_v20, 0.0 }
 0x231   : > { %2055 = vst.msk [vmem:[%s3320_s30 + $0x88] sm:$0xff] %vm677_vm1, %v2023_v50 }
 0x232   : > { %2054 = vst.msk [vmem:[%s3320_s30 + $0x80] sm:$0xff] %vm677_vm1, %v2022_v29 }
 0x235   : > { %v2353_v25 = vpop.f32.mrb[18].mxu1 }
 0x236   : > { %v1943_v14 = vadd.f32 %v2353_v25, %v3312_v26  ;;  %v1937_v47 = vpop.f32.mrb[19].mxu1 }
 0x237   : > { %v1938_v41 = vadd.f32 %v3312_v26, %v1937_v47 }
 0x238   : > { %v2025_v22 = vmax.f32 %v1943_v14, 0.0 }
 0x239   : > { %v2024_v21 = vmax.f32 %v1938_v41, 0.0 }
 0x23a   : > { %2057 = vst.msk [vmem:[%s3320_s30 + $0x98] sm:$0xff] %vm677_vm1, %v2025_v22 }
 0x23b   : > { %2056 = vst.msk [vmem:[%s3320_s30 + $0x90] sm:$0xff] %vm677_vm1, %v2024_v21 }
 0x23d   : > { %v2356_v9 = vpop.f32.mrb[20].mxu1 }
 0x23e   : > { %v1953_v16 = vadd.f32 %v2356_v9, %v3312_v26  ;;  %v1947_v32 = vpop.f32.mrb[21].mxu1 }
 0x23f   : > { %v1948_v58 = vadd.f32 %v3312_v26, %v1947_v32 }
 0x240   : > { %v2027_v6 = vmax.f32 %v1953_v16, 0.0 }
 0x241   : > { %v2026_v31 = vmax.f32 %v1948_v58, 0.0 }
 0x242   : > { %2059 = vst.msk [vmem:[%s3320_s30 + $0xa8] sm:$0xff] %vm677_vm1, %v2027_v6 }
 0x243   : > { %2058 = vst.msk [vmem:[%s3320_s30 + $0xa0] sm:$0xff] %vm677_vm1, %v2026_v31 }
 0x247   : > { %v2359_v27 = vpop.f32.mrb[22].mxu1 }
 0x248   : > { %v1963_v17 = vadd.f32 %v2359_v27, %v3312_v26  ;;  %v1957_v39 = vpop.f32.mrb[23].mxu1 }
 0x249   : > { %v1958_v10 = vadd.f32 %v3312_v26, %v1957_v39 }
 0x24a   : > { %v2029_v56 = vmax.f32 %v1963_v17, 0.0 }
 0x24b   : > { %v2028_v37 = vmax.f32 %v1958_v10, 0.0 }
 0x24c   : > { %2061 = vst.msk [vmem:[%s3320_s30 + $0xb8] sm:$0xff] %vm677_vm1, %v2029_v56 }
 0x24d   : > { %2060 = vst.msk [vmem:[%s3320_s30 + $0xb0] sm:$0xff] %vm677_vm1, %v2028_v37 }
 0x250   : > { %v2362_v44 = vpop.f32.mrb[24].mxu1 }
 0x251   : > { %v1973_v61 = vadd.f32 %v2362_v44, %v3312_v26  ;;  %v1967_v63 = vpop.f32.mrb[25].mxu1 }
 0x252   : > { %v1968_v11 = vadd.f32 %v3312_v26, %v1967_v63 }
 0x253   : > { %v2031_v60 = vmax.f32 %v1973_v61, 0.0 }
 0x254   : > { %v2030_v19 = vmax.f32 %v1968_v11, 0.0 }
 0x255   : > { %2063 = vst.msk [vmem:[%s3320_s30 + $0xc8] sm:$0xff] %vm677_vm1, %v2031_v60 }
 0x256   : > { %2062 = vst.msk [vmem:[%s3320_s30 + $0xc0] sm:$0xff] %vm677_vm1, %v2030_v19 }
 0x259   : > { %v2365_v36 = vpop.f32.mrb[26].mxu1 }
 0x25a   : > { %v1983_v5 = vadd.f32 %v2365_v36, %v3312_v26  ;;  %v1977_v55 = vpop.f32.mrb[27].mxu1 }
 0x25b   : > { %v1978_v59 = vadd.f32 %v3312_v26, %v1977_v55 }
 0x25c   : > { %v2033_v15 = vmax.f32 %v1983_v5, 0.0 }
 0x25d   : > { %v2032_v23 = vmax.f32 %v1978_v59, 0.0 }
 0x25e   : > { %2065 = vst.msk [vmem:[%s3320_s30 + $0xd8] sm:$0xff] %vm677_vm1, %v2033_v15 }
 0x25f   : > { %2064 = vst.msk [vmem:[%s3320_s30 + $0xd0] sm:$0xff] %vm677_vm1, %v2032_v23 }
 0x261   : > { %v2368_v48 = vpop.f32.mrb[28].mxu1 }
 0x262   : > { %v1993_v45 = vadd.f32 %v2368_v48, %v3312_v26  ;;  %v1987_v8 = vpop.f32.mrb[29].mxu1 }
 0x263   : > { %v1988_v18 = vadd.f32 %v3312_v26, %v1987_v8 }
 0x264   : > { %v2035_v51 = vmax.f32 %v1993_v45, 0.0 }
 0x265   : > { %v2034_v28 = vmax.f32 %v1988_v18, 0.0 }
 0x266   : > { %2067 = vst.msk [vmem:[%s3320_s30 + $0xe8] sm:$0xff] %vm677_vm1, %v2035_v51 }
 0x267   : > { %2066 = vst.msk [vmem:[%s3320_s30 + $0xe0] sm:$0xff] %vm677_vm1, %v2034_v28 }
 0x26b   : > { %v2371_v1 = vpop.f32.mrb[30].mxu1 }
 0x26c   : > { %v2003_v49 = vadd.f32 %v2371_v1, %v3312_v26  ;;  %v1997_v30 = vpop.f32.mrb[31].mxu1 }
 0x26d   : > { %v1998_v42 = vadd.f32 %v3312_v26, %v1997_v30 }
 0x26e   : > { %v2037_v4 = vmax.f32 %v2003_v49, 0.0 }
 0x26f   : > { %v2036_v43 = vmax.f32 %v1998_v42, 0.0 }
 0x270   : > { %2069 = vst.msk [vmem:[%s3320_s30 + $0xf8] sm:$0xff] %vm677_vm1, %v2037_v4 }
 0x271   : > { %2068 = vst.msk [vmem:[%s3320_s30 + $0xf0] sm:$0xff] %vm677_vm1, %v2036_v43 }
 0x272 PF: > { %s17_s24 = sadd.s32 1, %s2388_s24  }
 0x273   : > { %p14_p4 = scmp.ge.s32.totalorder %s17_s24, 4  }
 0x275   :  { %16 = sbr.rel (!%p14_p4) target bundleno = 1 (0x1), region = 80 }

</bundles_post_ra>
